<compile_context>
chip_gen: v6e
topology: v6e:2x2x1
jax: 0.10.0
libtpu: 0.0.40
codegen_flags: <defaults>
</compile_context>

<pallas_src>
import math
import functools
import numpy as np
import jax
import jax.numpy as jnp
from jax.experimental import pallas as pl
from jax.experimental.pallas import tpu as pltpu

LANE = 128  # lane-dense padding for the classifier output


# ----------------------------- kernel ---------------------------------------


def _layernorm(v, gamma, beta, eps=1e-5):
    mu = jnp.mean(v, axis=-1, keepdims=True)
    var = jnp.mean((v - mu) ** 2, axis=-1, keepdims=True)
    return (v - mu) * jax.lax.rsqrt(var + eps) * gamma + beta


def fused_bert_kernel(
        x_ref, bias_ref,
        wqkv_ref, bqkv_ref,
        wo_ref, bo_ref,
        ln1g_ref, ln1b_ref,
        w1_ref, b1_ref, w2_ref, b2_ref,
        ln2g_ref, ln2b_ref,
        fng_ref, fnb_ref,
        wc1_ref, bc1_ref, wc2_ref, bc2_ref,
        out_ref,
        x_scr, ctx_scr,
        *, num_heads, seq_len):
    """Grid = (batch_tiles, num_layers). One grid step = one encoder block on one
    batch tile; the [CLS] classifier head runs only at the last layer iteration."""
    l = pl.program_id(1)
    n_layers = pl.num_programs(1)

    R, D = x_scr.shape                  # R = batch_tile * seq_len
    S = seq_len
    Bt = R // S
    H = num_heads
    hd = D // H
    scale = 1.0 / math.sqrt(hd)
    bf16 = jnp.bfloat16

    # Load embedded tokens into the resident VMEM activation at layer 0.
    @pl.when(l == 0)
    def _():
        x_scr[...] = x_ref[...]

    x = x_scr[...]                      # (R, D) f32 residual stream
    bias = bias_ref[...]                # (Bt, 1, S) additive key-padding bias (precomputed)

    # ---- pre-norm multi-head self-attention ---------------------------------
    h1 = _layernorm(x, ln1g_ref[0], ln1b_ref[0])
    # Fused QKV: one (R,D)@(D,3D) MXU pass, bias add in f32, then keep bf16.
    qkv = (jnp.dot(h1.astype(bf16), wqkv_ref[0], preferred_element_type=jnp.float32)
           + bqkv_ref[0]).astype(bf16)                       # (R, 3D) bf16

    for h in range(H):                  # static unroll over heads
        lo = h * hd
        qh = qkv[:, lo:lo + hd].reshape(Bt, S, hd)
        kh = qkv[:, D + lo:D + lo + hd].reshape(Bt, S, hd)
        vh = qkv[:, 2 * D + lo:2 * D + lo + hd].reshape(Bt, S, hd)
        s = jnp.einsum('bqd,bkd->bqk', qh, kh,
                       preferred_element_type=jnp.float32) * scale + bias
        s = s - jnp.max(s, axis=-1, keepdims=True)
        p = jnp.exp(s)
        p = p * pl.reciprocal(jnp.sum(p, axis=-1, keepdims=True), approx=True)
        ctx = jnp.einsum('bqk,bkd->bqd', p.astype(bf16), vh,
                         preferred_element_type=jnp.float32)  # (Bt, S, hd)
        # Write the head slab at its lane offset; no concat, no per-head K=hd dot.
        ctx_scr[:, lo:lo + hd] = ctx.reshape(R, hd).astype(bf16)

    # Single full-K output projection against the un-split Wo.
    attn = jnp.dot(ctx_scr[...], wo_ref[0], preferred_element_type=jnp.float32)
    x = x + attn + bo_ref[0]

    # ---- pre-norm position-wise feed-forward --------------------------------
    h2 = _layernorm(x, ln2g_ref[0], ln2b_ref[0])
    ff = jnp.dot(h2.astype(bf16), w1_ref[0],
                 preferred_element_type=jnp.float32) + b1_ref[0]
    ff = jnp.maximum(ff, 0.0)   # TODO(synk): FeedForward activation assumed ReLU (source not given).
    x = x + jnp.dot(ff.astype(bf16), w2_ref[0],
                    preferred_element_type=jnp.float32) + b2_ref[0]

    x_scr[...] = x

    # ---- final LayerNorm + classification head on [CLS] rows only -----------
    @pl.when(l == n_layers - 1)
    def _():
        cls = x.reshape(Bt, S, D)[:, 0, :]                   # (Bt, D) position-0 rows
        y = _layernorm(cls, fng_ref[...], fnb_ref[...])
        hc = jnp.tanh(jnp.dot(y.astype(bf16), wc1_ref[...],
                              preferred_element_type=jnp.float32) + bc1_ref[...])
        logits = jnp.dot(hc.astype(bf16), wc2_ref[...],
                         preferred_element_type=jnp.float32) + bc2_ref[...]
        out_ref[...] = logits.reshape(1, Bt, -1)             # lane-dense (Bt, 128) slab


# ----------------------------- wrapper ---------------------------------------


def _vmem_limit_bytes(R, D, F, S, Bt, H, T_pad):
    """Rough budget: 2x (double-buffered) streamed blocks + resident scratch +
    live in-kernel activations, with 25% headroom; clamped to [32, 96] MiB."""
    f32, bf16 = 4, 2
    layer_w = (D * 3 * D + D * D + D * F + F * D) * bf16 \
        + (3 * D + 5 * D + F) * f32
    head_w = (D * D + D * T_pad) * bf16 + (3 * D + T_pad) * f32
    streamed = R * D * f32 + Bt * S * f32 + Bt * T_pad * f32
    scratch = R * D * (f32 + bf16)
    live = 3 * R * D * f32 + R * 3 * D * bf16 + Bt * H * S * S * f32 + R * F * f32
    need = 2 * (layer_w + head_w + streamed) + scratch + live
    return int(min(96 * 2 ** 20, max(32 * 2 ** 20, int(need * 1.25))))


def bert_like_forward(params, input_ids, num_heads, pad_token_id=0, batch_tile=None):
    B, S = input_ids.shape
    D = params["emb"].shape[1]
    L, _, F = params["w1"].shape
    H = num_heads
    num_classes = params["wc2"].shape[1]
    T_pad = -(-num_classes // LANE) * LANE          # lane-dense logits slab

    if batch_tile is None:
        # n_bt >= 2 keeps both v7x TensorCores busy; on v5e (1 TC, lower HBM BW) pass
        # batch_tile=B explicitly to avoid re-streaming layer weights per batch tile.
        batch_tile = B // 2 if (B % 2 == 0 and B >= 2) else B
    assert B % batch_tile == 0
    n_bt = B // batch_tile
    R = batch_tile * S

    # glue: embedding gather + sqrt(d_model) scale + sinusoidal PE (dropout = identity)
    x = params["emb"][input_ids] * math.sqrt(D) + params["pe"][None, :S, :]
    x = x.reshape(B * S, D).astype(jnp.float32)
    # additive key-padding bias precomputed once (hoisted out of the per-layer body)
    attn_bias = jnp.where(input_ids == pad_token_id, -1e9, 0.0
                          ).astype(jnp.float32)[:, None, :]          # (B, 1, S)

    bf = jnp.bfloat16
    wqkv = jnp.concatenate([params["wq"], params["wk"], params["wv"]],
                           axis=-1).astype(bf)                       # (L, D, 3D)
    bqkv = jnp.concatenate([params["bq"], params["bk"], params["bv"]],
                           axis=-1).astype(jnp.float32)              # (L, 1, 3D)
    wo = params["wo"].astype(bf)
    w1, w2 = params["w1"].astype(bf), params["w2"].astype(bf)
    wc1 = params["wc1"].astype(bf)
    wc2p = jnp.zeros((D, T_pad), bf).at[:, :num_classes].set(params["wc2"].astype(bf))
    bc2p = jnp.zeros((1, T_pad), jnp.float32).at[:, :num_classes].set(params["bc2"])

    def wspec(shape):           # per-layer stacked weight, indexed by the layer axis
        nrest = len(shape) - 1
        return pl.BlockSpec(shape, lambda bt, l, _n=nrest: (l,) + (0,) * _n)

    def cspec(shape):           # layer-invariant weight (resident across the grid)
        nd = len(shape)
        return pl.BlockSpec(shape, lambda bt, l, _n=nd: (0,) * _n)

    in_specs = [
        pl.BlockSpec((R, D), lambda bt, l: (bt, 0)),                 # embedded tokens
        pl.BlockSpec((batch_tile, 1, S), lambda bt, l: (bt, 0, 0)),  # additive attn bias
        wspec((1, D, 3 * D)), wspec((1, 1, 3 * D)),                  # fused Wqkv, bqkv
        wspec((1, D, D)), wspec((1, 1, D)),                          # Wo (un-split), bo
        wspec((1, 1, D)), wspec((1, 1, D)),                          # LN1 gamma, beta
        wspec((1, D, F)), wspec((1, 1, F)),                          # FFN W1, b1
        wspec((1, F, D)), wspec((1, 1, D)),                          # FFN W2, b2
        wspec((1, 1, D)), wspec((1, 1, D)),                          # LN2 gamma, beta
        cspec((1, D)), cspec((1, D)),                                # final LN gamma, beta
        cspec((D, D)), cspec((1, D)),                                # classifier L1
        cspec((D, T_pad)), cspec((1, T_pad)),                        # classifier L2 (padded)
    ]

    kernel = functools.partial(fused_bert_kernel, num_heads=H, seq_len=S)
    out = pl.pallas_call(
        kernel,
        out_shape=jax.ShapeDtypeStruct((n_bt, batch_tile, T_pad), jnp.float32),
        grid_spec=pltpu.PrefetchScalarGridSpec(
            num_scalar_prefetch=0,
            grid=(n_bt, L),
            in_specs=in_specs,
            out_specs=pl.BlockSpec((1, batch_tile, T_pad), lambda bt, l: (bt, 0, 0)),
            scratch_shapes=[
                pltpu.VMEM((R, D), jnp.float32),     # resident residual stream
                pltpu.VMEM((R, D), jnp.bfloat16),    # per-head context slab (lane-concat)
            ],
        ),
        compiler_params=pltpu.CompilerParams(
            dimension_semantics=("parallel", "arbitrary"),
            vmem_limit_bytes=_vmem_limit_bytes(R, D, F, S, batch_tile, H, T_pad)),
    )(x, attn_bias,
      wqkv, bqkv,
      wo, params["bo"],
      params["ln1_g"], params["ln1_b"],
      w1, params["b1"], w2, params["b2"],
      params["ln2_g"], params["ln2_b"],
      params["fn_g"], params["fn_b"],
      wc1, params["bc1"], wc2p, bc2p)

    # (n_bt, batch_tile, T_pad) -> (B, num_classes); tiles partition the batch in order.
    return out.reshape(B, T_pad)[:, :num_classes]


# ---------------------- parameter init / glue --------------------------------


def sinusoidal_pe(max_seq_len, d_model):
    pos = np.arange(max_seq_len, dtype=np.float32)[:, None]
    div = np.exp(np.arange(0, d_model, 2, dtype=np.float32)
                 * (-np.log(10000.0) / d_model))
    pe = np.zeros((max_seq_len, d_model), dtype=np.float32)
    pe[:, 0::2] = np.sin(pos * div)
    pe[:, 1::2] = np.cos(pos * div)
    return jnp.asarray(pe)


def init_params(key, vocab_size, d_model, num_layers, num_classes, d_ff,
                max_seq_len, pad_token_id=0):
    std = 0.02
    L, D, F = num_layers, d_model, d_ff
    keys = jax.random.split(key, 6 * L + 3)
    ki = iter(keys[1:])

    def nrm(k, shape):
        return std * jax.random.normal(k, shape, jnp.float32)

    def stack(shape):
        return jnp.stack([nrm(next(ki), shape) for _ in range(L)])

    emb = nrm(keys[0], (vocab_size, d_model)).at[pad_token_id].set(0.0)

    params = dict(
        emb=emb, pe=sinusoidal_pe(max_seq_len, d_model),
        wq=stack((D, D)), bq=jnp.zeros((L, 1, D), jnp.float32),
        wk=stack((D, D)), bk=jnp.zeros((L, 1, D), jnp.float32),
        wv=stack((D, D)), bv=jnp.zeros((L, 1, D), jnp.float32),
        wo=stack((D, D)), bo=jnp.zeros((L, 1, D), jnp.float32),
        ln1_g=jnp.ones((L, 1, D), jnp.float32), ln1_b=jnp.zeros((L, 1, D), jnp.float32),
        w1=stack((D, F)), b1=jnp.zeros((L, 1, F), jnp.float32),
        w2=stack((F, D)), b2=jnp.zeros((L, 1, D), jnp.float32),
        ln2_g=jnp.ones((L, 1, D), jnp.float32), ln2_b=jnp.zeros((L, 1, D), jnp.float32),
        fn_g=jnp.ones((1, D), jnp.float32), fn_b=jnp.zeros((1, D), jnp.float32),
        wc1=nrm(next(ki), (D, D)), bc1=jnp.zeros((1, D), jnp.float32),
        wc2=nrm(next(ki), (D, num_classes)),
        bc2=jnp.zeros((1, num_classes), jnp.float32),
    )
    return params


# ------------------------------- main -----------------------------------------


if __name__ == "__main__":
    vocab_size = 100
    d_model = 128                 # lane-dense: last dims are multiples of 128
    num_heads = 4                 # head_dim = 32
    num_layers = 2
    num_classes = 5
    d_ff = 4 * d_model            # PyTorch default when d_ff is None
    max_seq_len = 64
    B, S = 2, 8                   # batch_tile defaults to 1 -> n_bt = 2 (v7x: 2 TCs)

    key = jax.random.PRNGKey(0)
    pkey, dkey = jax.random.split(key)
    params = init_params(pkey, vocab_size, d_model, num_layers, num_classes,
                         d_ff, max_seq_len)

    input_ids = jax.random.randint(dkey, (B, S), 1, vocab_size, dtype=jnp.int32)
    input_ids = input_ids.at[:, -2:].set(0)      # a couple of padding tokens

    logits = bert_like_forward(params, input_ids, num_heads)
    jax.block_until_ready(logits)
    assert logits.shape == (B, num_classes)
    assert bool(jnp.all(jnp.isfinite(logits)))
    print("KERNEL_OK")
</pallas_src>

<mosaic_0001>
module attributes {stable_mosaic.version = 11 : i64} {
  func.func @fused_bert_kernel(%arg0: i32, %arg1: i32, %arg2: memref<8x128xf32, #tpu.memory_space<vmem>>, %arg3: memref<1x1x8xf32, #tpu.memory_space<vmem>>, %arg4: memref<1x128x384xbf16, #tpu.memory_space<vmem>>, %arg5: memref<1x1x384xf32, #tpu.memory_space<vmem>>, %arg6: memref<1x128x128xbf16, #tpu.memory_space<vmem>>, %arg7: memref<1x1x128xf32, #tpu.memory_space<vmem>>, %arg8: memref<1x1x128xf32, #tpu.memory_space<vmem>>, %arg9: memref<1x1x128xf32, #tpu.memory_space<vmem>>, %arg10: memref<1x128x512xbf16, #tpu.memory_space<vmem>>, %arg11: memref<1x1x512xf32, #tpu.memory_space<vmem>>, %arg12: memref<1x512x128xbf16, #tpu.memory_space<vmem>>, %arg13: memref<1x1x128xf32, #tpu.memory_space<vmem>>, %arg14: memref<1x1x128xf32, #tpu.memory_space<vmem>>, %arg15: memref<1x1x128xf32, #tpu.memory_space<vmem>>, %arg16: memref<1x128xf32, #tpu.memory_space<vmem>>, %arg17: memref<1x128xf32, #tpu.memory_space<vmem>>, %arg18: memref<128x128xbf16, #tpu.memory_space<vmem>>, %arg19: memref<1x128xf32, #tpu.memory_space<vmem>>, %arg20: memref<128x128xbf16, #tpu.memory_space<vmem>>, %arg21: memref<1x128xf32, #tpu.memory_space<vmem>>, %arg22: memref<1x1x128xf32, #tpu.memory_space<vmem>>, %arg23: memref<8x128xf32, #tpu.memory_space<vmem>>, %arg24: memref<8x128xbf16, #tpu.memory_space<vmem>>) attributes {dimension_semantics = [#tpu.dimension_semantics<parallel>, #tpu.dimension_semantics<arbitrary>], iteration_bounds = array<i64: 2, 2>, scalar_prefetch = 0 : i64, scratch_operands = 2 : i64, tpu.core_type = #tpu.core_type<tc>, window_params = [{transform_indices = @transform_0, window_bounds = array<i64: 8, 128>}, {transform_indices = @transform_1, window_bounds = array<i64: 1, 1, 8>}, {transform_indices = @transform_2, window_bounds = array<i64: 1, 128, 384>}, {transform_indices = @transform_3, window_bounds = array<i64: 1, 1, 384>}, {transform_indices = @transform_4, window_bounds = array<i64: 1, 128, 128>}, {transform_indices = @transform_5, window_bounds = array<i64: 1, 1, 128>}, {transform_indices = @transform_6, window_bounds = array<i64: 1, 1, 128>}, {transform_indices = @transform_7, window_bounds = array<i64: 1, 1, 128>}, {transform_indices = @transform_8, window_bounds = array<i64: 1, 128, 512>}, {transform_indices = @transform_9, window_bounds = array<i64: 1, 1, 512>}, {transform_indices = @transform_10, window_bounds = array<i64: 1, 512, 128>}, {transform_indices = @transform_11, window_bounds = array<i64: 1, 1, 128>}, {transform_indices = @transform_12, window_bounds = array<i64: 1, 1, 128>}, {transform_indices = @transform_13, window_bounds = array<i64: 1, 1, 128>}, {pipeline_mode = #tpu.pipeline_mode<synchronous>, transform_indices = @transform_14, window_bounds = array<i64: 1, 128>}, {pipeline_mode = #tpu.pipeline_mode<synchronous>, transform_indices = @transform_15, window_bounds = array<i64: 1, 128>}, {pipeline_mode = #tpu.pipeline_mode<synchronous>, transform_indices = @transform_16, window_bounds = array<i64: 128, 128>}, {pipeline_mode = #tpu.pipeline_mode<synchronous>, transform_indices = @transform_17, window_bounds = array<i64: 1, 128>}, {pipeline_mode = #tpu.pipeline_mode<synchronous>, transform_indices = @transform_18, window_bounds = array<i64: 128, 128>}, {pipeline_mode = #tpu.pipeline_mode<synchronous>, transform_indices = @transform_19, window_bounds = array<i64: 1, 128>}, {transform_indices = @transform_20, window_bounds = array<i64: 1, 1, 128>}]} {
    %c0_i32 = arith.constant 0 : i32
    %0 = arith.cmpi eq, %arg1, %c0_i32 : i32
    %1 = arith.extui %0 : i1 to i32
    %c0_i32_0 = arith.constant 0 : i32
    %2 = arith.cmpi ne, %1, %c0_i32_0 : i32
    scf.if %2 {
      %c0_85 = arith.constant 0 : index
      %c0_86 = arith.constant 0 : index
      %202 = vector.load %arg2[%c0_85, %c0_86] : memref<8x128xf32, #tpu.memory_space<vmem>>, vector<8x128xf32>
      %c0_87 = arith.constant 0 : index
      %c0_88 = arith.constant 0 : index
      %203 = vector.load %arg23[%c0_87, %c0_88] : memref<8x128xf32, #tpu.memory_space<vmem>>, vector<8x128xf32>
      tpu.vector_store %arg23[%c0_87, %c0_88], %202 {strides = array<i32>} : memref<8x128xf32, #tpu.memory_space<vmem>>, vector<8x128xf32>,
    } else {
    }
    %c0 = arith.constant 0 : index
    %c0_1 = arith.constant 0 : index
    %3 = vector.load %arg23[%c0, %c0_1] : memref<8x128xf32, #tpu.memory_space<vmem>>, vector<8x128xf32>
    %c0_2 = arith.constant 0 : index
    %c0_3 = arith.constant 0 : index
    %c0_4 = arith.constant 0 : index
    %4 = vector.load %arg3[%c0_2, %c0_3, %c0_4] : memref<1x1x8xf32, #tpu.memory_space<vmem>>, vector<1x1x8xf32>
    %c0_5 = arith.constant 0 : index
    %c0_6 = arith.constant 0 : index
    %c0_7 = arith.constant 0 : index
    %5 = vector.load %arg8[%c0_5, %c0_6, %c0_7] : memref<1x1x128xf32, #tpu.memory_space<vmem>>, vector<1x1x128xf32>
    %6 = vector.shape_cast %5 : vector<1x1x128xf32> to vector<1x128xf32>
    %c0_8 = arith.constant 0 : index
    %c0_9 = arith.constant 0 : index
    %c0_10 = arith.constant 0 : index
    %7 = vector.load %arg9[%c0_8, %c0_9, %c0_10] : memref<1x1x128xf32, #tpu.memory_space<vmem>>, vector<1x1x128xf32>
    %8 = vector.shape_cast %7 : vector<1x1x128xf32> to vector<1x128xf32>
    %cst = arith.constant dense<0.000000e+00> : vector<8xf32>
    %9 = vector.multi_reduction <add>, %3, %cst [1] : vector<8x128xf32> to vector<8xf32>
    %10 = vector.shape_cast %9 : vector<8xf32> to vector<8x1xf32>
    %cst_11 = arith.constant 1.280000e+02 : f32
    %11 = vector.broadcast %cst_11 : f32 to vector<8x1xf32>
    %12 = arith.divf %10, %11 : vector<8x1xf32>
    %13 = vector.broadcast %12 : vector<8x1xf32> to vector<8x128xf32>
    %14 = arith.subf %3, %13 : vector<8x128xf32>
    %15 = arith.mulf %14, %14 : vector<8x128xf32>
    %cst_12 = arith.constant dense<0.000000e+00> : vector<8xf32>
    %16 = vector.multi_reduction <add>, %15, %cst_12 [1] : vector<8x128xf32> to vector<8xf32>
    %17 = vector.shape_cast %16 : vector<8xf32> to vector<8x1xf32>
    %cst_13 = arith.constant 1.280000e+02 : f32
    %18 = vector.broadcast %cst_13 : f32 to vector<8x1xf32>
    %19 = arith.divf %17, %18 : vector<8x1xf32>
    %20 = vector.broadcast %12 : vector<8x1xf32> to vector<8x128xf32>
    %21 = arith.subf %3, %20 : vector<8x128xf32>
    %cst_14 = arith.constant 9.99999974E-6 : f32
    %22 = vector.broadcast %cst_14 : f32 to vector<8x1xf32>
    %23 = arith.addf %19, %22 : vector<8x1xf32>
    %24 = math.rsqrt %23 : vector<8x1xf32>
    %25 = vector.broadcast %24 : vector<8x1xf32> to vector<8x128xf32>
    %26 = arith.mulf %21, %25 : vector<8x128xf32>
    %27 = vector.broadcast %6 : vector<1x128xf32> to vector<8x128xf32>
    %28 = arith.mulf %26, %27 : vector<8x128xf32>
    %29 = vector.broadcast %8 : vector<1x128xf32> to vector<8x128xf32>
    %30 = arith.addf %28, %29 : vector<8x128xf32>
    %31 = arith.truncf %30 : vector<8x128xf32> to vector<8x128xbf16>
    %c0_15 = arith.constant 0 : index
    %c0_16 = arith.constant 0 : index
    %c0_17 = arith.constant 0 : index
    %32 = vector.load %arg4[%c0_15, %c0_16, %c0_17] : memref<1x128x384xbf16, #tpu.memory_space<vmem>>, vector<1x128x384xbf16>
    %33 = vector.shape_cast %32 : vector<1x128x384xbf16> to vector<128x384xbf16>
    %cst_18 = arith.constant dense<0.000000e+00> : vector<8x384xf32>
    %34 = tpu.matmul %31, %33, %cst_18 {dimension_numbers = #tpu.dot_dimension_numbers<[1], [0], [0], [1], [0, 0, 1, 1], [], []>} : vector<8x128xbf16>, vector<128x384xbf16>, vector<8x384xf32> -> vector<8x384xf32>
    %c0_19 = arith.constant 0 : index
    %c0_20 = arith.constant 0 : index
    %c0_21 = arith.constant 0 : index
    %35 = vector.load %arg5[%c0_19, %c0_20, %c0_21] : memref<1x1x384xf32, #tpu.memory_space<vmem>>, vector<1x1x384xf32>
    %36 = vector.shape_cast %35 : vector<1x1x384xf32> to vector<1x384xf32>
    %37 = vector.broadcast %36 : vector<1x384xf32> to vector<8x384xf32>
    %38 = arith.addf %34, %37 : vector<8x384xf32>
    %39 = arith.truncf %38 : vector<8x384xf32> to vector<8x384xbf16>
    %40 = vector.extract_strided_slice %39 {offsets = [0, 0], sizes = [8, 32], strides = [1, 1]} : vector<8x384xbf16> to vector<8x32xbf16>
    %41 = vector.shape_cast %40 : vector<8x32xbf16> to vector<1x8x32xbf16>
    %42 = vector.extract_strided_slice %39 {offsets = [0, 128], sizes = [8, 32], strides = [1, 1]} : vector<8x384xbf16> to vector<8x32xbf16>
    %43 = vector.shape_cast %42 : vector<8x32xbf16> to vector<1x8x32xbf16>
    %44 = vector.extract_strided_slice %39 {offsets = [0, 256], sizes = [8, 32], strides = [1, 1]} : vector<8x384xbf16> to vector<8x32xbf16>
    %45 = vector.shape_cast %44 : vector<8x32xbf16> to vector<1x8x32xbf16>
    "tpu.trace_start"() <{level = 10 : i32, message = "bqd,bkd->bqk"}> : () -> ()
    %cst_22 = arith.constant dense<0.000000e+00> : vector<1x8x8xf32>
    %46 = tpu.matmul %41, %43, %cst_22 {dimension_numbers = #tpu.dot_dimension_numbers<[2], [2], [1], [1], [0, 0, 0, 1, 1, 1], [0], [0]>} : vector<1x8x32xbf16>, vector<1x8x32xbf16>, vector<1x8x8xf32> -> vector<1x8x8xf32>
    "tpu.trace_stop"() : () -> ()
    %cst_23 = arith.constant 0.176776692 : f32
    %47 = vector.broadcast %cst_23 : f32 to vector<1x8x8xf32>
    %48 = arith.mulf %46, %47 : vector<1x8x8xf32>
    %49 = vector.broadcast %4 : vector<1x1x8xf32> to vector<1x8x8xf32>
    %50 = arith.addf %48, %49 : vector<1x8x8xf32>
    %cst_24 = arith.constant dense<0xFF800000> : vector<1x8xf32>
    %51 = vector.multi_reduction <maximumf>, %50, %cst_24 [2] : vector<1x8x8xf32> to vector<1x8xf32>
    %52 = vector.shape_cast %51 : vector<1x8xf32> to vector<1x8x1xf32>
    %53 = vector.broadcast %52 : vector<1x8x1xf32> to vector<1x8x8xf32>
    %54 = arith.subf %50, %53 : vector<1x8x8xf32>
    %55 = math.exp %54 : vector<1x8x8xf32>
    %cst_25 = arith.constant dense<0.000000e+00> : vector<1x8xf32>
    %56 = vector.multi_reduction <add>, %55, %cst_25 [2] : vector<1x8x8xf32> to vector<1x8xf32>
    %57 = vector.shape_cast %56 : vector<1x8xf32> to vector<1x8x1xf32>
    %58 = tpu.reciprocal %57 {approx = true} : vector<1x8x1xf32> -> vector<1x8x1xf32>
    %59 = vector.broadcast %58 : vector<1x8x1xf32> to vector<1x8x8xf32>
    %60 = arith.mulf %55, %59 : vector<1x8x8xf32>
    %61 = arith.truncf %60 : vector<1x8x8xf32> to vector<1x8x8xbf16>
    "tpu.trace_start"() <{level = 10 : i32, message = "bqk,bkd->bqd"}> : () -> ()
    %cst_26 = arith.constant dense<0.000000e+00> : vector<1x8x32xf32>
    %62 = tpu.matmul %61, %45, %cst_26 {dimension_numbers = #tpu.dot_dimension_numbers<[2], [1], [1], [2], [0, 0, 0, 1, 1, 2], [0], [0]>} : vector<1x8x8xbf16>, vector<1x8x32xbf16>, vector<1x8x32xf32> -> vector<1x8x32xf32>
    "tpu.trace_stop"() : () -> ()
    %63 = vector.shape_cast %62 : vector<1x8x32xf32> to vector<8x32xf32>
    %64 = arith.truncf %63 : vector<8x32xf32> to vector<8x32xbf16>
    %c0_27 = arith.constant 0 : index
    %c0_28 = arith.constant 0 : index
    %65 = vector.load %arg24[%c0_27, %c0_28] : memref<8x128xbf16, #tpu.memory_space<vmem>>, vector<8x32xbf16>
    tpu.vector_store %arg24[%c0_27, %c0_28], %64 {strides = array<i32>} : memref<8x128xbf16, #tpu.memory_space<vmem>>, vector<8x32xbf16>,
    %66 = vector.extract_strided_slice %39 {offsets = [0, 32], sizes = [8, 32], strides = [1, 1]} : vector<8x384xbf16> to vector<8x32xbf16>
    %67 = vector.shape_cast %66 : vector<8x32xbf16> to vector<1x8x32xbf16>
    %68 = vector.extract_strided_slice %39 {offsets = [0, 160], sizes = [8, 32], strides = [1, 1]} : vector<8x384xbf16> to vector<8x32xbf16>
    %69 = vector.shape_cast %68 : vector<8x32xbf16> to vector<1x8x32xbf16>
    %70 = vector.extract_strided_slice %39 {offsets = [0, 288], sizes = [8, 32], strides = [1, 1]} : vector<8x384xbf16> to vector<8x32xbf16>
    %71 = vector.shape_cast %70 : vector<8x32xbf16> to vector<1x8x32xbf16>
    "tpu.trace_start"() <{level = 10 : i32, message = "bqd,bkd->bqk"}> : () -> ()
    %cst_29 = arith.constant dense<0.000000e+00> : vector<1x8x8xf32>
    %72 = tpu.matmul %67, %69, %cst_29 {dimension_numbers = #tpu.dot_dimension_numbers<[2], [2], [1], [1], [0, 0, 0, 1, 1, 1], [0], [0]>} : vector<1x8x32xbf16>, vector<1x8x32xbf16>, vector<1x8x8xf32> -> vector<1x8x8xf32>
    "tpu.trace_stop"() : () -> ()
    %cst_30 = arith.constant 0.176776692 : f32
    %73 = vector.broadcast %cst_30 : f32 to vector<1x8x8xf32>
    %74 = arith.mulf %72, %73 : vector<1x8x8xf32>
    %75 = vector.broadcast %4 : vector<1x1x8xf32> to vector<1x8x8xf32>
    %76 = arith.addf %74, %75 : vector<1x8x8xf32>
    %cst_31 = arith.constant dense<0xFF800000> : vector<1x8xf32>
    %77 = vector.multi_reduction <maximumf>, %76, %cst_31 [2] : vector<1x8x8xf32> to vector<1x8xf32>
    %78 = vector.shape_cast %77 : vector<1x8xf32> to vector<1x8x1xf32>
    %79 = vector.broadcast %78 : vector<1x8x1xf32> to vector<1x8x8xf32>
    %80 = arith.subf %76, %79 : vector<1x8x8xf32>
    %81 = math.exp %80 : vector<1x8x8xf32>
    %cst_32 = arith.constant dense<0.000000e+00> : vector<1x8xf32>
    %82 = vector.multi_reduction <add>, %81, %cst_32 [2] : vector<1x8x8xf32> to vector<1x8xf32>
    %83 = vector.shape_cast %82 : vector<1x8xf32> to vector<1x8x1xf32>
    %84 = tpu.reciprocal %83 {approx = true} : vector<1x8x1xf32> -> vector<1x8x1xf32>
    %85 = vector.broadcast %84 : vector<1x8x1xf32> to vector<1x8x8xf32>
    %86 = arith.mulf %81, %85 : vector<1x8x8xf32>
    %87 = arith.truncf %86 : vector<1x8x8xf32> to vector<1x8x8xbf16>
    "tpu.trace_start"() <{level = 10 : i32, message = "bqk,bkd->bqd"}> : () -> ()
    %cst_33 = arith.constant dense<0.000000e+00> : vector<1x8x32xf32>
    %88 = tpu.matmul %87, %71, %cst_33 {dimension_numbers = #tpu.dot_dimension_numbers<[2], [1], [1], [2], [0, 0, 0, 1, 1, 2], [0], [0]>} : vector<1x8x8xbf16>, vector<1x8x32xbf16>, vector<1x8x32xf32> -> vector<1x8x32xf32>
    "tpu.trace_stop"() : () -> ()
    %89 = vector.shape_cast %88 : vector<1x8x32xf32> to vector<8x32xf32>
    %90 = arith.truncf %89 : vector<8x32xf32> to vector<8x32xbf16>
    %c0_34 = arith.constant 0 : index
    %c32 = arith.constant 32 : index
    %91 = vector.load %arg24[%c0_34, %c32] : memref<8x128xbf16, #tpu.memory_space<vmem>>, vector<8x32xbf16>
    tpu.vector_store %arg24[%c0_34, %c32], %90 {strides = array<i32>} : memref<8x128xbf16, #tpu.memory_space<vmem>>, vector<8x32xbf16>,
    %92 = vector.extract_strided_slice %39 {offsets = [0, 64], sizes = [8, 32], strides = [1, 1]} : vector<8x384xbf16> to vector<8x32xbf16>
    %93 = vector.shape_cast %92 : vector<8x32xbf16> to vector<1x8x32xbf16>
    %94 = vector.extract_strided_slice %39 {offsets = [0, 192], sizes = [8, 32], strides = [1, 1]} : vector<8x384xbf16> to vector<8x32xbf16>
    %95 = vector.shape_cast %94 : vector<8x32xbf16> to vector<1x8x32xbf16>
    %96 = vector.extract_strided_slice %39 {offsets = [0, 320], sizes = [8, 32], strides = [1, 1]} : vector<8x384xbf16> to vector<8x32xbf16>
    %97 = vector.shape_cast %96 : vector<8x32xbf16> to vector<1x8x32xbf16>
    "tpu.trace_start"() <{level = 10 : i32, message = "bqd,bkd->bqk"}> : () -> ()
    %cst_35 = arith.constant dense<0.000000e+00> : vector<1x8x8xf32>
    %98 = tpu.matmul %93, %95, %cst_35 {dimension_numbers = #tpu.dot_dimension_numbers<[2], [2], [1], [1], [0, 0, 0, 1, 1, 1], [0], [0]>} : vector<1x8x32xbf16>, vector<1x8x32xbf16>, vector<1x8x8xf32> -> vector<1x8x8xf32>
    "tpu.trace_stop"() : () -> ()
    %cst_36 = arith.constant 0.176776692 : f32
    %99 = vector.broadcast %cst_36 : f32 to vector<1x8x8xf32>
    %100 = arith.mulf %98, %99 : vector<1x8x8xf32>
    %101 = vector.broadcast %4 : vector<1x1x8xf32> to vector<1x8x8xf32>
    %102 = arith.addf %100, %101 : vector<1x8x8xf32>
    %cst_37 = arith.constant dense<0xFF800000> : vector<1x8xf32>
    %103 = vector.multi_reduction <maximumf>, %102, %cst_37 [2] : vector<1x8x8xf32> to vector<1x8xf32>
    %104 = vector.shape_cast %103 : vector<1x8xf32> to vector<1x8x1xf32>
    %105 = vector.broadcast %104 : vector<1x8x1xf32> to vector<1x8x8xf32>
    %106 = arith.subf %102, %105 : vector<1x8x8xf32>
    %107 = math.exp %106 : vector<1x8x8xf32>
    %cst_38 = arith.constant dense<0.000000e+00> : vector<1x8xf32>
    %108 = vector.multi_reduction <add>, %107, %cst_38 [2] : vector<1x8x8xf32> to vector<1x8xf32>
    %109 = vector.shape_cast %108 : vector<1x8xf32> to vector<1x8x1xf32>
    %110 = tpu.reciprocal %109 {approx = true} : vector<1x8x1xf32> -> vector<1x8x1xf32>
    %111 = vector.broadcast %110 : vector<1x8x1xf32> to vector<1x8x8xf32>
    %112 = arith.mulf %107, %111 : vector<1x8x8xf32>
    %113 = arith.truncf %112 : vector<1x8x8xf32> to vector<1x8x8xbf16>
    "tpu.trace_start"() <{level = 10 : i32, message = "bqk,bkd->bqd"}> : () -> ()
    %cst_39 = arith.constant dense<0.000000e+00> : vector<1x8x32xf32>
    %114 = tpu.matmul %113, %97, %cst_39 {dimension_numbers = #tpu.dot_dimension_numbers<[2], [1], [1], [2], [0, 0, 0, 1, 1, 2], [0], [0]>} : vector<1x8x8xbf16>, vector<1x8x32xbf16>, vector<1x8x32xf32> -> vector<1x8x32xf32>
    "tpu.trace_stop"() : () -> ()
    %115 = vector.shape_cast %114 : vector<1x8x32xf32> to vector<8x32xf32>
    %116 = arith.truncf %115 : vector<8x32xf32> to vector<8x32xbf16>
    %c0_40 = arith.constant 0 : index
    %c64 = arith.constant 64 : index
    %117 = vector.load %arg24[%c0_40, %c64] : memref<8x128xbf16, #tpu.memory_space<vmem>>, vector<8x32xbf16>
    tpu.vector_store %arg24[%c0_40, %c64], %116 {strides = array<i32>} : memref<8x128xbf16, #tpu.memory_space<vmem>>, vector<8x32xbf16>,
    %118 = vector.extract_strided_slice %39 {offsets = [0, 96], sizes = [8, 32], strides = [1, 1]} : vector<8x384xbf16> to vector<8x32xbf16>
    %119 = vector.shape_cast %118 : vector<8x32xbf16> to vector<1x8x32xbf16>
    %120 = vector.extract_strided_slice %39 {offsets = [0, 224], sizes = [8, 32], strides = [1, 1]} : vector<8x384xbf16> to vector<8x32xbf16>
    %121 = vector.shape_cast %120 : vector<8x32xbf16> to vector<1x8x32xbf16>
    %122 = vector.extract_strided_slice %39 {offsets = [0, 352], sizes = [8, 32], strides = [1, 1]} : vector<8x384xbf16> to vector<8x32xbf16>
    %123 = vector.shape_cast %122 : vector<8x32xbf16> to vector<1x8x32xbf16>
    "tpu.trace_start"() <{level = 10 : i32, message = "bqd,bkd->bqk"}> : () -> ()
    %cst_41 = arith.constant dense<0.000000e+00> : vector<1x8x8xf32>
    %124 = tpu.matmul %119, %121, %cst_41 {dimension_numbers = #tpu.dot_dimension_numbers<[2], [2], [1], [1], [0, 0, 0, 1, 1, 1], [0], [0]>} : vector<1x8x32xbf16>, vector<1x8x32xbf16>, vector<1x8x8xf32> -> vector<1x8x8xf32>
    "tpu.trace_stop"() : () -> ()
    %cst_42 = arith.constant 0.176776692 : f32
    %125 = vector.broadcast %cst_42 : f32 to vector<1x8x8xf32>
    %126 = arith.mulf %124, %125 : vector<1x8x8xf32>
    %127 = vector.broadcast %4 : vector<1x1x8xf32> to vector<1x8x8xf32>
    %128 = arith.addf %126, %127 : vector<1x8x8xf32>
    %cst_43 = arith.constant dense<0xFF800000> : vector<1x8xf32>
    %129 = vector.multi_reduction <maximumf>, %128, %cst_43 [2] : vector<1x8x8xf32> to vector<1x8xf32>
    %130 = vector.shape_cast %129 : vector<1x8xf32> to vector<1x8x1xf32>
    %131 = vector.broadcast %130 : vector<1x8x1xf32> to vector<1x8x8xf32>
    %132 = arith.subf %128, %131 : vector<1x8x8xf32>
    %133 = math.exp %132 : vector<1x8x8xf32>
    %cst_44 = arith.constant dense<0.000000e+00> : vector<1x8xf32>
    %134 = vector.multi_reduction <add>, %133, %cst_44 [2] : vector<1x8x8xf32> to vector<1x8xf32>
    %135 = vector.shape_cast %134 : vector<1x8xf32> to vector<1x8x1xf32>
    %136 = tpu.reciprocal %135 {approx = true} : vector<1x8x1xf32> -> vector<1x8x1xf32>
    %137 = vector.broadcast %136 : vector<1x8x1xf32> to vector<1x8x8xf32>
    %138 = arith.mulf %133, %137 : vector<1x8x8xf32>
    %139 = arith.truncf %138 : vector<1x8x8xf32> to vector<1x8x8xbf16>
    "tpu.trace_start"() <{level = 10 : i32, message = "bqk,bkd->bqd"}> : () -> ()
    %cst_45 = arith.constant dense<0.000000e+00> : vector<1x8x32xf32>
    %140 = tpu.matmul %139, %123, %cst_45 {dimension_numbers = #tpu.dot_dimension_numbers<[2], [1], [1], [2], [0, 0, 0, 1, 1, 2], [0], [0]>} : vector<1x8x8xbf16>, vector<1x8x32xbf16>, vector<1x8x32xf32> -> vector<1x8x32xf32>
    "tpu.trace_stop"() : () -> ()
    %141 = vector.shape_cast %140 : vector<1x8x32xf32> to vector<8x32xf32>
    %142 = arith.truncf %141 : vector<8x32xf32> to vector<8x32xbf16>
    %c0_46 = arith.constant 0 : index
    %c96 = arith.constant 96 : index
    %143 = vector.load %arg24[%c0_46, %c96] : memref<8x128xbf16, #tpu.memory_space<vmem>>, vector<8x32xbf16>
    tpu.vector_store %arg24[%c0_46, %c96], %142 {strides = array<i32>} : memref<8x128xbf16, #tpu.memory_space<vmem>>, vector<8x32xbf16>,
    %c0_47 = arith.constant 0 : index
    %c0_48 = arith.constant 0 : index
    %144 = vector.load %arg24[%c0_47, %c0_48] : memref<8x128xbf16, #tpu.memory_space<vmem>>, vector<8x128xbf16>
    %c0_49 = arith.constant 0 : index
    %c0_50 = arith.constant 0 : index
    %c0_51 = arith.constant 0 : index
    %145 = vector.load %arg6[%c0_49, %c0_50, %c0_51] : memref<1x128x128xbf16, #tpu.memory_space<vmem>>, vector<1x128x128xbf16>
    %146 = vector.shape_cast %145 : vector<1x128x128xbf16> to vector<128x128xbf16>
    %cst_52 = arith.constant dense<0.000000e+00> : vector<8x128xf32>
    %147 = tpu.matmul %144, %146, %cst_52 {dimension_numbers = #tpu.dot_dimension_numbers<[1], [0], [0], [1], [0, 0, 1, 1], [], []>} : vector<8x128xbf16>, vector<128x128xbf16>, vector<8x128xf32> -> vector<8x128xf32>
    %148 = arith.addf %3, %147 : vector<8x128xf32>
    %c0_53 = arith.constant 0 : index
    %c0_54 = arith.constant 0 : index
    %c0_55 = arith.constant 0 : index
    %149 = vector.load %arg7[%c0_53, %c0_54, %c0_55] : memref<1x1x128xf32, #tpu.memory_space<vmem>>, vector<1x1x128xf32>
    %150 = vector.shape_cast %149 : vector<1x1x128xf32> to vector<1x128xf32>
    %151 = vector.broadcast %150 : vector<1x128xf32> to vector<8x128xf32>
    %152 = arith.addf %148, %151 : vector<8x128xf32>
    %c0_56 = arith.constant 0 : index
    %c0_57 = arith.constant 0 : index
    %c0_58 = arith.constant 0 : index
    %153 = vector.load %arg14[%c0_56, %c0_57, %c0_58] : memref<1x1x128xf32, #tpu.memory_space<vmem>>, vector<1x1x128xf32>
    %154 = vector.shape_cast %153 : vector<1x1x128xf32> to vector<1x128xf32>
    %c0_59 = arith.constant 0 : index
    %c0_60 = arith.constant 0 : index
    %c0_61 = arith.constant 0 : index
    %155 = vector.load %arg15[%c0_59, %c0_60, %c0_61] : memref<1x1x128xf32, #tpu.memory_space<vmem>>, vector<1x1x128xf32>
    %156 = vector.shape_cast %155 : vector<1x1x128xf32> to vector<1x128xf32>
    %cst_62 = arith.constant dense<0.000000e+00> : vector<8xf32>
    %157 = vector.multi_reduction <add>, %152, %cst_62 [1] : vector<8x128xf32> to vector<8xf32>
    %158 = vector.shape_cast %157 : vector<8xf32> to vector<8x1xf32>
    %cst_63 = arith.constant 1.280000e+02 : f32
    %159 = vector.broadcast %cst_63 : f32 to vector<8x1xf32>
    %160 = arith.divf %158, %159 : vector<8x1xf32>
    %161 = vector.broadcast %160 : vector<8x1xf32> to vector<8x128xf32>
    %162 = arith.subf %152, %161 : vector<8x128xf32>
    %163 = arith.mulf %162, %162 : vector<8x128xf32>
    %cst_64 = arith.constant dense<0.000000e+00> : vector<8xf32>
    %164 = vector.multi_reduction <add>, %163, %cst_64 [1] : vector<8x128xf32> to vector<8xf32>
    %165 = vector.shape_cast %164 : vector<8xf32> to vector<8x1xf32>
    %cst_65 = arith.constant 1.280000e+02 : f32
    %166 = vector.broadcast %cst_65 : f32 to vector<8x1xf32>
    %167 = arith.divf %165, %166 : vector<8x1xf32>
    %168 = vector.broadcast %160 : vector<8x1xf32> to vector<8x128xf32>
    %169 = arith.subf %152, %168 : vector<8x128xf32>
    %cst_66 = arith.constant 9.99999974E-6 : f32
    %170 = vector.broadcast %cst_66 : f32 to vector<8x1xf32>
    %171 = arith.addf %167, %170 : vector<8x1xf32>
    %172 = math.rsqrt %171 : vector<8x1xf32>
    %173 = vector.broadcast %172 : vector<8x1xf32> to vector<8x128xf32>
    %174 = arith.mulf %169, %173 : vector<8x128xf32>
    %175 = vector.broadcast %154 : vector<1x128xf32> to vector<8x128xf32>
    %176 = arith.mulf %174, %175 : vector<8x128xf32>
    %177 = vector.broadcast %156 : vector<1x128xf32> to vector<8x128xf32>
    %178 = arith.addf %176, %177 : vector<8x128xf32>
    %179 = arith.truncf %178 : vector<8x128xf32> to vector<8x128xbf16>
    %c0_67 = arith.constant 0 : index
    %c0_68 = arith.constant 0 : index
    %c0_69 = arith.constant 0 : index
    %180 = vector.load %arg10[%c0_67, %c0_68, %c0_69] : memref<1x128x512xbf16, #tpu.memory_space<vmem>>, vector<1x128x512xbf16>
    %181 = vector.shape_cast %180 : vector<1x128x512xbf16> to vector<128x512xbf16>
    %cst_70 = arith.constant dense<0.000000e+00> : vector<8x512xf32>
    %182 = tpu.matmul %179, %181, %cst_70 {dimension_numbers = #tpu.dot_dimension_numbers<[1], [0], [0], [1], [0, 0, 1, 1], [], []>} : vector<8x128xbf16>, vector<128x512xbf16>, vector<8x512xf32> -> vector<8x512xf32>
    %c0_71 = arith.constant 0 : index
    %c0_72 = arith.constant 0 : index
    %c0_73 = arith.constant 0 : index
    %183 = vector.load %arg11[%c0_71, %c0_72, %c0_73] : memref<1x1x512xf32, #tpu.memory_space<vmem>>, vector<1x1x512xf32>
    %184 = vector.shape_cast %183 : vector<1x1x512xf32> to vector<1x512xf32>
    %185 = vector.broadcast %184 : vector<1x512xf32> to vector<8x512xf32>
    %186 = arith.addf %182, %185 : vector<8x512xf32>
    %cst_74 = arith.constant 0.000000e+00 : f32
    %187 = vector.broadcast %cst_74 : f32 to vector<8x512xf32>
    %188 = arith.maximumf %186, %187 : vector<8x512xf32>
    %189 = arith.truncf %188 : vector<8x512xf32> to vector<8x512xbf16>
    %c0_75 = arith.constant 0 : index
    %c0_76 = arith.constant 0 : index
    %c0_77 = arith.constant 0 : index
    %190 = vector.load %arg12[%c0_75, %c0_76, %c0_77] : memref<1x512x128xbf16, #tpu.memory_space<vmem>>, vector<1x512x128xbf16>
    %191 = vector.shape_cast %190 : vector<1x512x128xbf16> to vector<512x128xbf16>
    %cst_78 = arith.constant dense<0.000000e+00> : vector<8x128xf32>
    %192 = tpu.matmul %189, %191, %cst_78 {dimension_numbers = #tpu.dot_dimension_numbers<[1], [0], [0], [1], [0, 0, 1, 1], [], []>} : vector<8x512xbf16>, vector<512x128xbf16>, vector<8x128xf32> -> vector<8x128xf32>
    %193 = arith.addf %152, %192 : vector<8x128xf32>
    %c0_79 = arith.constant 0 : index
    %c0_80 = arith.constant 0 : index
    %c0_81 = arith.constant 0 : index
    %194 = vector.load %arg13[%c0_79, %c0_80, %c0_81] : memref<1x1x128xf32, #tpu.memory_space<vmem>>, vector<1x1x128xf32>
    %195 = vector.shape_cast %194 : vector<1x1x128xf32> to vector<1x128xf32>
    %196 = vector.broadcast %195 : vector<1x128xf32> to vector<8x128xf32>
    %197 = arith.addf %193, %196 : vector<8x128xf32>
    %c0_82 = arith.constant 0 : index
    %c0_83 = arith.constant 0 : index
    %198 = vector.load %arg23[%c0_82, %c0_83] : memref<8x128xf32, #tpu.memory_space<vmem>>, vector<8x128xf32>
    tpu.vector_store %arg23[%c0_82, %c0_83], %197 {strides = array<i32>} : memref<8x128xf32, #tpu.memory_space<vmem>>, vector<8x128xf32>,
    %c1_i32 = arith.constant 1 : i32
    %199 = arith.cmpi eq, %arg1, %c1_i32 : i32
    %200 = arith.extui %199 : i1 to i32
    %c0_i32_84 = arith.constant 0 : i32
    %201 = arith.cmpi ne, %200, %c0_i32_84 : i32
    scf.if %201 {
      %202 = vector.shape_cast %197 : vector<8x128xf32> to vector<1x8x128xf32>
      %203 = vector.extract_strided_slice %202 {offsets = [0, 0, 0], sizes = [1, 1, 128], strides = [1, 1, 1]} : vector<1x8x128xf32> to vector<1x1x128xf32>
      %204 = vector.shape_cast %203 : vector<1x1x128xf32> to vector<1x128xf32>
      %c0_85 = arith.constant 0 : index
      %c0_86 = arith.constant 0 : index
      %205 = vector.load %arg16[%c0_85, %c0_86] : memref<1x128xf32, #tpu.memory_space<vmem>>, vector<1x128xf32>
      %c0_87 = arith.constant 0 : index
      %c0_88 = arith.constant 0 : index
      %206 = vector.load %arg17[%c0_87, %c0_88] : memref<1x128xf32, #tpu.memory_space<vmem>>, vector<1x128xf32>
      %cst_89 = arith.constant dense<0.000000e+00> : vector<1xf32>
      %207 = vector.multi_reduction <add>, %204, %cst_89 [1] : vector<1x128xf32> to vector<1xf32>
      %208 = vector.shape_cast %207 : vector<1xf32> to vector<1x1xf32>
      %cst_90 = arith.constant 1.280000e+02 : f32
      %209 = vector.broadcast %cst_90 : f32 to vector<1x1xf32>
      %210 = arith.divf %208, %209 : vector<1x1xf32>
      %211 = vector.broadcast %210 : vector<1x1xf32> to vector<1x128xf32>
      %212 = arith.subf %204, %211 : vector<1x128xf32>
      %213 = arith.mulf %212, %212 : vector<1x128xf32>
      %cst_91 = arith.constant dense<0.000000e+00> : vector<1xf32>
      %214 = vector.multi_reduction <add>, %213, %cst_91 [1] : vector<1x128xf32> to vector<1xf32>
      %215 = vector.shape_cast %214 : vector<1xf32> to vector<1x1xf32>
      %cst_92 = arith.constant 1.280000e+02 : f32
      %216 = vector.broadcast %cst_92 : f32 to vector<1x1xf32>
      %217 = arith.divf %215, %216 : vector<1x1xf32>
      %218 = vector.broadcast %210 : vector<1x1xf32> to vector<1x128xf32>
      %219 = arith.subf %204, %218 : vector<1x128xf32>
      %cst_93 = arith.constant 9.99999974E-6 : f32
      %220 = vector.broadcast %cst_93 : f32 to vector<1x1xf32>
      %221 = arith.addf %217, %220 : vector<1x1xf32>
      %222 = math.rsqrt %221 : vector<1x1xf32>
      %223 = vector.broadcast %222 : vector<1x1xf32> to vector<1x128xf32>
      %224 = arith.mulf %219, %223 : vector<1x128xf32>
      %225 = arith.mulf %224, %205 : vector<1x128xf32>
      %226 = arith.addf %225, %206 : vector<1x128xf32>
      %227 = arith.truncf %226 : vector<1x128xf32> to vector<1x128xbf16>
      %c0_94 = arith.constant 0 : index
      %c0_95 = arith.constant 0 : index
      %228 = vector.load %arg18[%c0_94, %c0_95] : memref<128x128xbf16, #tpu.memory_space<vmem>>, vector<128x128xbf16>
      %cst_96 = arith.constant dense<0.000000e+00> : vector<1x128xf32>
      %229 = tpu.matmul %227, %228, %cst_96 {dimension_numbers = #tpu.dot_dimension_numbers<[1], [0], [0], [1], [0, 0, 1, 1], [], []>} : vector<1x128xbf16>, vector<128x128xbf16>, vector<1x128xf32> -> vector<1x128xf32>
      %c0_97 = arith.constant 0 : index
      %c0_98 = arith.constant 0 : index
      %230 = vector.load %arg19[%c0_97, %c0_98] : memref<1x128xf32, #tpu.memory_space<vmem>>, vector<1x128xf32>
      %231 = arith.addf %229, %230 : vector<1x128xf32>
      %232 = math.tanh %231 : vector<1x128xf32>
      %233 = arith.truncf %232 : vector<1x128xf32> to vector<1x128xbf16>
      %c0_99 = arith.constant 0 : index
      %c0_100 = arith.constant 0 : index
      %234 = vector.load %arg20[%c0_99, %c0_100] : memref<128x128xbf16, #tpu.memory_space<vmem>>, vector<128x128xbf16>
      %cst_101 = arith.constant dense<0.000000e+00> : vector<1x128xf32>
      %235 = tpu.matmul %233, %234, %cst_101 {dimension_numbers = #tpu.dot_dimension_numbers<[1], [0], [0], [1], [0, 0, 1, 1], [], []>} : vector<1x128xbf16>, vector<128x128xbf16>, vector<1x128xf32> -> vector<1x128xf32>
      %c0_102 = arith.constant 0 : index
      %c0_103 = arith.constant 0 : index
      %236 = vector.load %arg21[%c0_102, %c0_103] : memref<1x128xf32, #tpu.memory_space<vmem>>, vector<1x128xf32>
      %237 = arith.addf %235, %236 : vector<1x128xf32>
      %238 = vector.shape_cast %237 : vector<1x128xf32> to vector<1x1x128xf32>
      %c0_104 = arith.constant 0 : index
      %c0_105 = arith.constant 0 : index
      %c0_106 = arith.constant 0 : index
      %239 = vector.load %arg22[%c0_104, %c0_105, %c0_106] : memref<1x1x128xf32, #tpu.memory_space<vmem>>, vector<1x1x128xf32>
      tpu.vector_store %arg22[%c0_104, %c0_105, %c0_106], %238 {strides = array<i32>} : memref<1x1x128xf32, #tpu.memory_space<vmem>>, vector<1x1x128xf32>,
    } else {
    }
    return
  }
  func.func @transform_0(%arg0: i32, %arg1: i32) -> (i32, i32) {
    %c0_i32 = arith.constant 0 : i32
    %c0_i32_0 = arith.constant 0 : i32
    return %arg0, %c0_i32 : i32, i32
  }
  func.func @transform_1(%arg0: i32, %arg1: i32) -> (i32, i32, i32) {
    %c0_i32 = arith.constant 0 : i32
    %c0_i32_0 = arith.constant 0 : i32
    %c0_i32_1 = arith.constant 0 : i32
    return %arg0, %c0_i32, %c0_i32_0 : i32, i32, i32
  }
  func.func @transform_2(%arg0: i32, %arg1: i32) -> (i32, i32, i32) {
    %c0_i32 = arith.constant 0 : i32
    %c0_i32_0 = arith.constant 0 : i32
    %c0_i32_1 = arith.constant 0 : i32
    return %arg1, %c0_i32, %c0_i32_0 : i32, i32, i32
  }
  func.func @transform_3(%arg0: i32, %arg1: i32) -> (i32, i32, i32) {
    %c0_i32 = arith.constant 0 : i32
    %c0_i32_0 = arith.constant 0 : i32
    %c0_i32_1 = arith.constant 0 : i32
    return %arg1, %c0_i32, %c0_i32_0 : i32, i32, i32
  }
  func.func @transform_4(%arg0: i32, %arg1: i32) -> (i32, i32, i32) {
    %c0_i32 = arith.constant 0 : i32
    %c0_i32_0 = arith.constant 0 : i32
    %c0_i32_1 = arith.constant 0 : i32
    return %arg1, %c0_i32, %c0_i32_0 : i32, i32, i32
  }
  func.func @transform_5(%arg0: i32, %arg1: i32) -> (i32, i32, i32) {
    %c0_i32 = arith.constant 0 : i32
    %c0_i32_0 = arith.constant 0 : i32
    %c0_i32_1 = arith.constant 0 : i32
    return %arg1, %c0_i32, %c0_i32_0 : i32, i32, i32
  }
  func.func @transform_6(%arg0: i32, %arg1: i32) -> (i32, i32, i32) {
    %c0_i32 = arith.constant 0 : i32
    %c0_i32_0 = arith.constant 0 : i32
    %c0_i32_1 = arith.constant 0 : i32
    return %arg1, %c0_i32, %c0_i32_0 : i32, i32, i32
  }
  func.func @transform_7(%arg0: i32, %arg1: i32) -> (i32, i32, i32) {
    %c0_i32 = arith.constant 0 : i32
    %c0_i32_0 = arith.constant 0 : i32
    %c0_i32_1 = arith.constant 0 : i32
    return %arg1, %c0_i32, %c0_i32_0 : i32, i32, i32
  }
  func.func @transform_8(%arg0: i32, %arg1: i32) -> (i32, i32, i32) {
    %c0_i32 = arith.constant 0 : i32
    %c0_i32_0 = arith.constant 0 : i32
    %c0_i32_1 = arith.constant 0 : i32
    return %arg1, %c0_i32, %c0_i32_0 : i32, i32, i32
  }
  func.func @transform_9(%arg0: i32, %arg1: i32) -> (i32, i32, i32) {
    %c0_i32 = arith.constant 0 : i32
    %c0_i32_0 = arith.constant 0 : i32
    %c0_i32_1 = arith.constant 0 : i32
    return %arg1, %c0_i32, %c0_i32_0 : i32, i32, i32
  }
  func.func @transform_10(%arg0: i32, %arg1: i32) -> (i32, i32, i32) {
    %c0_i32 = arith.constant 0 : i32
    %c0_i32_0 = arith.constant 0 : i32
    %c0_i32_1 = arith.constant 0 : i32
    return %arg1, %c0_i32, %c0_i32_0 : i32, i32, i32
  }
  func.func @transform_11(%arg0: i32, %arg1: i32) -> (i32, i32, i32) {
    %c0_i32 = arith.constant 0 : i32
    %c0_i32_0 = arith.constant 0 : i32
    %c0_i32_1 = arith.constant 0 : i32
    return %arg1, %c0_i32, %c0_i32_0 : i32, i32, i32
  }
  func.func @transform_12(%arg0: i32, %arg1: i32) -> (i32, i32, i32) {
    %c0_i32 = arith.constant 0 : i32
    %c0_i32_0 = arith.constant 0 : i32
    %c0_i32_1 = arith.constant 0 : i32
    return %arg1, %c0_i32, %c0_i32_0 : i32, i32, i32
  }
  func.func @transform_13(%arg0: i32, %arg1: i32) -> (i32, i32, i32) {
    %c0_i32 = arith.constant 0 : i32
    %c0_i32_0 = arith.constant 0 : i32
    %c0_i32_1 = arith.constant 0 : i32
    return %arg1, %c0_i32, %c0_i32_0 : i32, i32, i32
  }
  func.func @transform_14(%arg0: i32, %arg1: i32) -> (i32, i32) {
    %c0_i32 = arith.constant 0 : i32
    %c0_i32_0 = arith.constant 0 : i32
    %c0_i32_1 = arith.constant 0 : i32
    return %c0_i32, %c0_i32_0 : i32, i32
  }
  func.func @transform_15(%arg0: i32, %arg1: i32) -> (i32, i32) {
    %c0_i32 = arith.constant 0 : i32
    %c0_i32_0 = arith.constant 0 : i32
    %c0_i32_1 = arith.constant 0 : i32
    return %c0_i32, %c0_i32_0 : i32, i32
  }
  func.func @transform_16(%arg0: i32, %arg1: i32) -> (i32, i32) {
    %c0_i32 = arith.constant 0 : i32
    %c0_i32_0 = arith.constant 0 : i32
    %c0_i32_1 = arith.constant 0 : i32
    return %c0_i32, %c0_i32_0 : i32, i32
  }
  func.func @transform_17(%arg0: i32, %arg1: i32) -> (i32, i32) {
    %c0_i32 = arith.constant 0 : i32
    %c0_i32_0 = arith.constant 0 : i32
    %c0_i32_1 = arith.constant 0 : i32
    return %c0_i32, %c0_i32_0 : i32, i32
  }
  func.func @transform_18(%arg0: i32, %arg1: i32) -> (i32, i32) {
    %c0_i32 = arith.constant 0 : i32
    %c0_i32_0 = arith.constant 0 : i32
    %c0_i32_1 = arith.constant 0 : i32
    return %c0_i32, %c0_i32_0 : i32, i32
  }
  func.func @transform_19(%arg0: i32, %arg1: i32) -> (i32, i32) {
    %c0_i32 = arith.constant 0 : i32
    %c0_i32_0 = arith.constant 0 : i32
    %c0_i32_1 = arith.constant 0 : i32
    return %c0_i32, %c0_i32_0 : i32, i32
  }
  func.func @transform_20(%arg0: i32, %arg1: i32) -> (i32, i32, i32) {
    %c0_i32 = arith.constant 0 : i32
    %c0_i32_0 = arith.constant 0 : i32
    %c0_i32_1 = arith.constant 0 : i32
    return %arg0, %c0_i32, %c0_i32_0 : i32, i32, i32
  }
}

</mosaic_0001>

<bundles_post_ra>
// kernel: tpu_custom_call.1
= control target key start
LH: loop header
LB: loop body
LE: loop exit
PB: predicated region body
PF: predicated region fallthrough
CT: control target
= control target key end

     0   :  { %s5081_s0 = inlined_call_operand.hbm [shape: f32[16,128], index: 0, kind: input, shape index: {}]   ;;  %s5082_s1 = inlined_call_operand.hbm [shape: f32[2,1,8], index: 1, kind: input, shape index: {}]   ;;  %s5083_s2 = inlined_call_operand.hbm [shape: bf16[2,128,384], index: 2, kind: input, shape index: {}]   ;;  %s5084_s3 = inlined_call_operand.hbm [shape: f32[2,1,384], index: 3, kind: input, shape index: {}]   ;;  %s5085_s4 = inlined_call_operand.hbm [shape: bf16[2,128,128], index: 4, kind: input, shape index: {}]   ;;  %s5086_s5 = inlined_call_operand.vmem [shape: f32[2,1,128], index: 5, kind: input, shape index: {}]   ;;  %s5087_s6 = inlined_call_operand.vmem [shape: f32[2,1,128], index: 6, kind: input, shape index: {}]   ;;  %s5088_s7 = inlined_call_operand.vmem [shape: f32[2,1,128], index: 7, kind: input, shape index: {}]   ;;  %s5089_s8 = inlined_call_operand.hbm [shape: bf16[2,128,512], index: 8, kind: input, shape index: {}]   ;;  %s5090_s9 = inlined_call_operand.vmem [shape: f32[2,1,512], index: 9, kind: input, shape index: {}]   ;;  %s5091_s10 = inlined_call_operand.hbm [shape: bf16[2,512,128], index: 10, kind: input, shape index: {}]   ;;  %s5092_s11 = inlined_call_operand.vmem [shape: f32[2,1,128], index: 11, kind: input, shape index: {}]   ;;  %s5093_s12 = inlined_call_operand.vmem [shape: f32[2,1,128], index: 12, kind: input, shape index: {}]   ;;  %s5094_s13 = inlined_call_operand.vmem [shape: f32[2,1,128], index: 13, kind: input, shape index: {}]   ;;  %s5095_s14 = inlined_call_operand.vmem [shape: f32[1,128], index: 14, kind: input, shape index: {}]   ;;  %s5096_s15 = inlined_call_operand.vmem [shape: f32[1,128], index: 15, kind: input, shape index: {}]   ;;  %s5097_s16 = inlined_call_operand.hbm [shape: bf16[128,128], index: 16, kind: input, shape index: {}]   ;;  %s5098_s17 = inlined_call_operand.vmem [shape: f32[1,128], index: 17, kind: input, shape index: {}]   ;;  %s5099_s18 = inlined_call_operand.hbm [shape: bf16[128,128], index: 18, kind: input, shape index: {}]   ;;  %s5100_s19 = inlined_call_operand.vmem [shape: f32[1,128], index: 19, kind: input, shape index: {}]   ;;  %s5101_s20 = inlined_call_operand.hbm [shape: f32[2,1,128], index: 20, kind: output, shape index: {}]  }
   0x1   :  { %5133 = sst [smem:[#allocation44_spill]] %s5081_s0 }
   0x2   :  { %5134 = sst [smem:[#allocation45_spill]] %s5082_s1 }
   0x3   :  { %5135 = sst [smem:[#allocation46_spill]] %s5083_s2 }
   0x4   :  { %5136 = sst [smem:[#allocation47_spill]] %s5084_s3 }
   0x5   :  { %5137 = sst [smem:[#allocation48_spill]] %s5085_s4 }
   0x6   :  { %5138 = sst [smem:[#allocation49_spill]] %s5086_s5 }
   0x7   :  { %5139 = sst [smem:[#allocation50_spill]] %s5087_s6 }
   0x8   :  { %5140 = sst [smem:[#allocation51_spill]] %s5088_s7 }
   0x9   :  { %5141 = sst [smem:[#allocation52_spill]] %s5089_s8 }
   0xa   :  { %5142 = sst [smem:[#allocation53_spill]] %s5090_s9 }
   0xb   :  { %5143 = sst [smem:[#allocation54_spill]] %s5091_s10 }
   0xc   :  { %5144 = sst [smem:[#allocation55_spill]] %s5092_s11 }
   0xd   :  { %5145 = sst [smem:[#allocation56_spill]] %s5093_s12 }
   0xe   :  { %5146 = sst [smem:[#allocation57_spill]] %s5094_s13 }
   0xf   :  { %5147 = sst [smem:[#allocation58_spill]] %s5095_s14 }
  0x10   :  { %5148 = sst [smem:[#allocation59_spill]] %s5096_s15 }
  0x11   :  { %5149 = sst [smem:[#allocation60_spill]] %s5097_s16 }
  0x12   :  { %5150 = sst [smem:[#allocation61_spill]] %s5098_s17 }
  0x13   :  { %5151 = sst [smem:[#allocation62_spill]] %s5099_s18 }
  0x14   :  { %5152 = sst [smem:[#allocation63_spill]] %s5100_s19 }
  0x15   :  { %5153 = sst [smem:[#allocation64_spill]] %s5101_s20 }
  0x16   :  { %25 = vsyncpa [#allocation5], 0 }
  0x17   :  { %27 = vsyncpa [#allocation5 + $0x1], 0 }
  0x18   :  { %28 = vsyncpa [#allocation8], 0 }
  0x19   :  { %30 = vsyncpa [#allocation8 + $0x1], 0 }
  0x1a   :  { %31 = vsyncpa [#allocation11], 0 }
  0x1b   :  { %33 = vsyncpa [#allocation11 + $0x1], 0 }
  0x1c   :  { %34 = vsyncpa [#allocation14], 0 }
  0x1d   :  { %36 = vsyncpa [#allocation14 + $0x1], 0 }
  0x1e   :  { %37 = vsyncpa [#allocation17], 0 }
  0x1f   :  { %38 = vsyncpa [#allocation6], 0 }
  0x20   :  { %40 = vsyncpa [#allocation6 + $0x1], 0  ;;  %s4366_s1 = smov 0   ;;  %s4368_s22 = smov 0  }
  0x21   :  { %s4370_s23 = smov 0   ;;  %s4372_s24 = smov 0  }
  0x22   :  { %s4374_s2 = smov 0   ;;  %s4376_s25 = smov 0  }
  0x23   :  { %s4378_s3 = smov 0   ;;  %s4380_s26 = smov 0  }
  0x24   :  { %s4382_s27 = smov 0   ;;  %s4384_s28 = smov 0  }
  0x25   :  { %s4386_s4 = smov 0  }
  0x26 LB: > { %5154 = sst [smem:[#allocation27_spill]] %s4199_s22  ;;  %s4420_s29 = sadd.s32 4294967295, %s4235_s4   ;;  %s4235_s4 = sphi %s4386_s4, %s46_s4   ;;  %s4231_s28 = sphi %s4384_s28, %s5248_s28   ;;  %s4227_s27 = sphi %s4382_s27, %s5247_s27   ;;  %s4223_s26 = sphi %s4380_s26, %s5246_s26   ;;  %s4219_s3 = sphi %s4378_s3, %s5245_s3   ;;  %s4215_s25 = sphi %s4376_s25, %s5244_s25   ;;  %s4211_s2 = sphi %s4374_s2, %s5250_s2   ;;  %s4207_s24 = sphi %s4372_s24, %s5249_s24   ;;  %s4203_s23 = sphi %s4370_s23, %s5242_s23   ;;  %s4199_s22 = sphi %s4368_s22, %s5241_s22   ;;  %s4195_s1 = sphi %s4366_s1, %s5240_s1  }
  0x27   : > { %5155 = sst [smem:[#allocation28_spill]] %s4203_s23  ;;  %p130_p0 = scmp.ne.s32.totalorder %s4199_s22, %s4195_s1 }
  0x28   : > { %5156 = sst [smem:[#allocation29_spill]] %s4207_s24  ;;  %p5108_p1 = scmp.eq.s32.totalorder %s4420_s29, 0 }
  0x29   : > { %5157 = sst [smem:[#allocation30_spill]] %s4215_s25  ;;  %p3123_p2 = scmp.ge.s32.totalorder %s4235_s4, 1 }
  0x2a   : > { %5158 = sst [smem:[#allocation31_spill]] %s4219_s3  ;;  %p579_p3 = scmp.lt.s32.totalorder %s4235_s4, 5 }
  0x2b   : > { %5159 = sst [smem:[#allocation32_spill]] %s4223_s26  ;;  %p4428_p4 = por %p130_p0, %p5108_p1 }
  0x2c   : > { %5160 = sst [smem:[#allocation33_spill]] %s4227_s27  ;;  %p4432_p5 = pnand %p3123_p2, %p579_p3 }
  0x2d   : > { %5161 = sst [smem:[#allocation34_spill]] %s4231_s28  ;;  %s4237_s21 = smov [#allocation16]  }
  0x2e   : > { %5162 = sst [smem:[#allocation35_spill]] %s4235_s4  ;;  %s597_s20 = sshll.u32 %s4237_s21, 4  ;;  %s598_s20 = int_to_ptr.vmem [resolvable:$true] %s597_s20 }
  0x2f   : > { %5163 = sst [smem:[#allocation36_spill]] %s4420_s29  ;;  %p3544_p6 = pneg %p4432_p5 }
  0x30   : > { %s5164_s30 = scalar_select %p4428_p4, 1, 0 }
  0x31   : > { %s5166_s0 = scalar_select %p4432_p5, 1, 0 }
  0x32   : > { %5165 = sst [smem:[#allocation37_spill]] %s5164_s30  ;;  %p4440_p7 = pnand %p3544_p6, %p5108_p1 }
  0x33   : > { %s3858_s26 = scalar_lea.vmem %s598_s20, 1024  ;;  %p3866_p12 = scmp.lt.s32.totalorder %s598_s20, %s598_s20 }
  0x34   : > { %p5103_p8 = pneg %p4440_p7  ;;  %p3859_p9 = scmp.ne.s32.totalorder %s598_s20, %s3858_s26 }
  0x35   : > { %p3867_p13 = scmp.lt.s32.totalorder %s3858_s26, %s3858_s26 }
  0x36   : > { %p3861_p10 = pnand %p3859_p9, %p5103_p8 }
  0x37   : > { %p3868_p0 = por %p3867_p13, %p3866_p12 }
  0x38   : > { %p3862_p11 = pneg %p3861_p10 }
  0x3a   : > { %p3869_p2 = pnand %p3868_p0, %p3862_p11 }
  0x3c   : > { %3872 = shalt.err (!%p3869_p2)
}
  0x3d   : > { %s5106_s21 = smov 64   ;;  %s5109_s19 = smov 4  }
  0x3e   : > { %s5168_s16 = sld [smem:[#allocation60_spill]]  ;;  %s3122_s15 = sadd.s32 4294967294, %s4235_s4  }
  0x3f   : > { %p72_p3 = scmp.ne.s32.totalorder %s4215_s25, %s4211_s2  ;;  %p73_p6 = scmp.eq.s32.totalorder %s4235_s4, 0 }
  0x40   : > { %p78_p9 = scmp.ne.s32.totalorder %s4211_s2, %s4207_s24  ;;  %p124_p11 = scmp.ne.s32.totalorder %s4203_s23, %s4199_s22 }
  0x41   : > { %p74_p10 = por %p73_p6, %p72_p3  ;;  %p566_p13 = scmp.eq.s32.totalorder %s4420_s29, 3 }
  0x42   : > { %p4470_p12 = por %p5108_p1, %p78_p9  ;;  %p4475_p0 = por %p124_p11, %p73_p6 }
  0x43   : > { %p572_p2 = scmp.eq.s32.totalorder %s3122_s15, 3  ;;  %p4479_p8 = por %p566_p13, %p72_p3 }
  0x44   : > { %3547 = dma.hbm_to_vmem [thread:$0]  (!%p4440_p7), %s5168_s16, 1024, %s598_s20, [#allocation17], %s5106_s21, %s5106_s21, %s5109_s19  }
  0x45   : > { %s5171_s20 = scalar_select %p4479_p8, 1, 0 }
  0x46   : > { %p3579_p4 = scmp.lt.s32.totalorder %s4235_s4, 4  ;;  %p4484_p5 = por %p572_p2, %p78_p9 }
  0x47   : > { %5172 = sst [smem:[#allocation38_spill]] %s5171_s20  ;;  %s4489_s21 = sand.u32 1, %s4215_s25  }
  0x48   : > { %s5173_s26 = scalar_select %p4484_p5, 1, 0 }
  0x49   : > { %p4491_p1 = pnand %p3579_p4, %p74_p10  ;;  %s4496_s13 = sand.u32 1, %s4235_s4  }
  0x4a   : > { %5174 = sst [smem:[#allocation39_spill]] %s5173_s26  ;;  %s3129_s15 = sshll.u32 %s4231_s28, 4 }
  0x4b   : > { %s5176_s16 = sld [smem:[#allocation45_spill]]  ;;  %s651_s20 = scalar_lea.vmem [#allocation7], %s4489_s21 }
  0x4c   : > { %s658_s9 = sshll.u32 %s651_s20, 4  ;;  %p4505_p3 = pnand %p3579_p4, %p4475_p0  ;;  %s659_s9 = int_to_ptr.vmem [resolvable:$true] %s658_s9 }
  0x4d   : > { %s5117_s7 = scalar_lea.sflag [#allocation8], %s4496_s13  ;;  %p5125_p6 = pneg %p4491_p1 }
  0x4e   : > { %s3886_s6 = scalar_lea.vmem %s659_s9, 16  ;;  %s4240_s4 = smov [#allocation7]  }
  0x4f   : > { %p3887_p9 = scmp.ne.s32.totalorder %s659_s9, %s3886_s6  ;;  %s3891_s12 = sshll.u32 %s4240_s4, 4  ;;  %s3892_s12 = int_to_ptr.vmem [resolvable:$false] %s3891_s12 }
  0x50   : > { %s3893_s14 = scalar_lea.vmem %s3892_s12, 32  ;;  %p3894_p13 = scmp.lt.s32.totalorder %s659_s9, %s3892_s12 }
  0x51   : > { %s656_s24 = scalar_lea.hbm %s5176_s16, %s3129_s15  ;;  %p3889_p10 = pnand %p3887_p9, %p5125_p6 }
  0x52   : > { %p3895_p2 = scmp.lt.s32.totalorder %s3893_s14, %s3886_s6 }
  0x53   : > { %p3890_p11 = pneg %p3889_p10 }
  0x54   : > { %p3896_p5 = por %p3895_p2, %p3894_p13 }
  0x56   : > { %p3897_p4 = pnand %p3896_p5, %p3890_p11 }
  0x58   : > { %3900 = shalt.err (!%p3897_p4)
}
  0x59   : > { %3557 = dma.hbm_to_vmem [thread:$0]  (!%p4491_p1), %s656_s24, 16, %s659_s9, %s5117_s7  }
  0x5a   : > { %s4520_s16 = sand.u32 1, %s4203_s23   ;;  %s55_s4 = sadd.s32 1, %s4227_s27 }
  0x5b   : > { %p56_p5 = scmp.ge.s32.totalorder %s55_s4, 2  ;;  %s3516_s17 = smul.u32 3, %s4520_s16 }
  0x5c   : > { %s3517_s20 = smul.u32 48, %s4227_s27  ;;  %s5179_s12 = sadd.s32 1, %s4231_s28 }
  0x5d   : > { %s5252_s4 = smov (%p56_p5, %s55_s4), 0  ;;  %s5254_s12 = smov (!%p56_p5, %s5179_s12), %s4231_s28 }
  0x5e   : > { %5178 = sst [smem:[#allocation40_spill]] %s5252_s4  ;;  %s114_s9 = ssub.s32 %s4227_s27, %s5252_s4 }
  0x5f   : > { %p60_p0 = scmp.ge.s32.totalorder %s5254_s12, 2  ;;  %p115_p9 = scmp.eq.s32.totalorder %s114_s9, 0 }
  0x60   : > { %s5180_s7 = sld [smem:[#allocation47_spill]]  ;;  %s690_s5 = scalar_lea.vmem [#allocation10], %s3516_s17 }
  0x61   : > { %s698_s3 = sshll.u32 %s690_s5, 4  ;;  %s5256_s12 = smov (%p60_p0, %s5254_s12), 0  ;;  %s699_s3 = int_to_ptr.vmem [resolvable:$true] %s698_s3 }
  0x62   : > { %5181 = sst [smem:[#allocation41_spill]] %s5256_s12  ;;  %s5182_s30 = sadd.s32 1, %s4203_s23 }
  0x63   : > { %s4542_s22 = scalar_select %p115_p9, %s4203_s23, %s5182_s30  }
  0x64   : > { %s62_s15 = ssub.s32 %s4231_s28, %s5256_s12  ;;  %s5128_s4 = scalar_lea.sflag [#allocation11], %s4496_s13 }
  0x65   : > { %5183 = sst [smem:[#allocation42_spill]] %s4542_s22  ;;  %p4546_p10 = scmp.eq.s32.totalorder %s62_s15, 0 }
  0x66   : > { %s696_s6 = scalar_lea.hbm %s5180_s7, %s3517_s20  ;;  %p4553_p11 = pneg %p4505_p3 }
  0x67   : > { %s3914_s5 = scalar_lea.vmem %s699_s3, 48  ;;  %s4241_s7 = smov [#allocation10]  }
  0x68   : > { %p3915_p13 = scmp.ne.s32.totalorder %s699_s3, %s3914_s5  ;;  %s3919_s30 = sshll.u32 %s4241_s7, 4  ;;  %s3920_s30 = int_to_ptr.vmem [resolvable:$false] %s3919_s30 }
  0x69   : > { %s3921_s17 = scalar_lea.vmem %s3920_s30, 96  ;;  %p3922_p5 = scmp.lt.s32.totalorder %s699_s3, %s3920_s30 }
  0x6a   : > { %p3917_p2 = pnand %p3915_p13, %p4553_p11  ;;  %p3923_p0 = scmp.lt.s32.totalorder %s3921_s17, %s3914_s5 }
  0x6c   : > { %p3918_p4 = pneg %p3917_p2  ;;  %p3924_p9 = por %p3923_p0, %p3922_p5 }
  0x6e   : > { %p3925_p6 = pnand %p3924_p9, %p3918_p4 }
  0x70   : > { %3928 = shalt.err (!%p3925_p6)
}
  0x71   : > { %3563 = dma.hbm_to_vmem [thread:$0]  (!%p4505_p3), %s696_s6, 48, %s699_s3, %s5128_s4  }
  0x72   : > { %s5186_s20 = sadd.s32 1, %s4215_s25  ;;  %s3285_s24 = sshll.u32 %s4227_s27, 12 }
  0x73   : > { %s4568_s15 = scalar_select %p4546_p10, %s4215_s25, %s5186_s20  }
  0x74   : > { %s5188_s14 = sshll.u32 %s4520_s16, 8  ;;  %s5189_s8 = sld [smem:[#allocation52_spill]] }
  0x75   : > { %5187 = sst [smem:[#allocation43_spill]] %s4568_s15  ;;  %s748_s5 = scalar_lea.vmem [#allocation13], %s5188_s14 }
  0x76   : > { %s755_s7 = sshll.u32 %s748_s5, 4  ;;  %s5129_s22 = scalar_lea.sflag [#allocation14], %s4496_s13  ;;  %s756_s7 = int_to_ptr.vmem [resolvable:$true] %s755_s7 }
  0x77   : > { %s3942_s23 = scalar_lea.vmem %s756_s7, 4096  ;;  %s4242_s3 = smov [#allocation13]  }
  0x78   : > { %p3943_p6 = scmp.ne.s32.totalorder %s756_s7, %s3942_s23  ;;  %s3947_s6 = sshll.u32 %s4242_s3, 4  ;;  %s3948_s6 = int_to_ptr.vmem [resolvable:$false] %s3947_s6 }
  0x79   : > { %s3949_s29 = scalar_lea.vmem %s3948_s6, 8192  ;;  %p3950_p10 = scmp.lt.s32.totalorder %s756_s7, %s3948_s6 }
  0x7a   : > { %s754_s12 = scalar_lea.hbm %s5189_s8, %s3285_s24  ;;  %p3945_p13 = pnand %p3943_p6, %p4553_p11 }
  0x7b   : > { %p3951_p4 = scmp.lt.s32.totalorder %s3949_s29, %s3942_s23 }
  0x7c   : > { %p3946_p2 = pneg %p3945_p13 }
  0x7d   : > { %p3952_p5 = por %p3951_p4, %p3950_p10 }
  0x7f   : > { %p3953_p0 = pnand %p3952_p5, %p3946_p2 }
  0x81   : > { %3956 = shalt.err (!%p3953_p0)
}
  0x82   : > { %s4243_s20 = smov 256   ;;  %s4244_s14 = smov 16  }
  0x83   : > { %3569 = dma.hbm_to_vmem [thread:$0]  (!%p4505_p3), %s754_s12, 4096, %s756_s7, %s5129_s22, %s4243_s20, %s4243_s20, %s4244_s14  }
  0x84   : > { %s5190_s10 = sld [smem:[#allocation54_spill]]  ;;  %s5191_s3 = sshll.u32 %s4520_s16, 8 }
  0x85   : > { %s776_s6 = scalar_lea.vmem [#allocation15], %s5191_s3  ;;  %s4245_s29 = smov [#allocation18]  }
  0x86   : > { %s783_s23 = sshll.u32 %s776_s6, 4  ;;  %s613_s4 = sshll.u32 %s4245_s29, 4  ;;  %s4590_s23 = int_to_ptr.vmem [resolvable:$true] %s783_s23  ;;  %s614_s4 = int_to_ptr.vmem [resolvable:$true] %s613_s4 }
  0x87   : > { %s3968_s8 = scalar_lea.vmem %s614_s4, 1024  ;;  %p5192_p6 = pneg %p4440_p7 }
  0x88   : > { %p3969_p9 = scmp.ne.s32.totalorder %s614_s4, %s3968_s8  ;;  %p3976_p10 = scmp.lt.s32.totalorder %s614_s4, %s614_s4 }
  0x89   : > { %p3977_p4 = scmp.lt.s32.totalorder %s3968_s8, %s3968_s8 }
  0x8a   : > { %s4586_s17 = scalar_lea.hbm %s5190_s10, %s3285_s24  ;;  %p3971_p13 = pnand %p3969_p9, %p5192_p6 }
  0x8b   : > { %p3978_p5 = por %p3977_p4, %p3976_p10 }
  0x8c   : > { %p3972_p2 = pneg %p3971_p13 }
  0x8e   : > { %p3979_p0 = pnand %p3978_p5, %p3972_p2 }
  0x90   : > { %3982 = shalt.err (!%p3979_p0)
}
  0x91   : > { %s5193_s12 = smov 4   ;;  %s5194_s24 = smov 64  }
  0x92   : > { %s5195_s18 = sld [smem:[#allocation62_spill]]  ;;  %s3127_s14 = sshll.u32 %s4489_s21, 3 }
  0x93   : > { %s3128_s5 = sshll.u32 %s4231_s28, 7  ;;  %s5196_s3 = sld [smem:[#allocation44_spill]] }
  0x94   : > { %s634_s29 = scalar_lea.vmem [#allocation4], %s3127_s14  ;;  %s3515_s22 = smul.u32 3072, %s4227_s27 }
  0x95   : > { %s641_s1 = sshll.u32 %s634_s29, 4  ;;  %s631_s10 = scalar_lea.sflag [#allocation5], %s4489_s21  ;;  %s642_s1 = int_to_ptr.vmem [resolvable:$true] %s641_s1 }
  0x96   : > { %s3996_s15 = scalar_lea.vmem %s642_s1, 128  ;;  %p5197_p6 = pneg %p4491_p1 }
  0x97   : > { %p3997_p9 = scmp.ne.s32.totalorder %s642_s1, %s3996_s15  ;;  %s4246_s7 = smov [#allocation4]  }
  0x98   : > { %3550 = dma.hbm_to_vmem [thread:$0]  (!%p4440_p7), %s5195_s18, 1024, %s614_s4, [#allocation17], %s5194_s24, %s5194_s24, %s5193_s12  }
  0x99   : > { %s639_s6 = scalar_lea.hbm %s5196_s3, %s3128_s5  ;;  %p3999_p13 = pnand %p3997_p9, %p5197_p6 }
  0x9a   : > { %s4001_s20 = sshll.u32 %s4246_s7, 4  ;;  %s4002_s20 = int_to_ptr.vmem [resolvable:$false] %s4001_s20 }
  0x9b   : > { %p4000_p2 = pneg %p3999_p13  ;;  %s4003_s4 = scalar_lea.vmem %s4002_s20, 256 }
  0x9c   : > { %p4004_p7 = scmp.lt.s32.totalorder %s642_s1, %s4002_s20  ;;  %p4005_p10 = scmp.lt.s32.totalorder %s4003_s4, %s3996_s15 }
  0x9e   : > { %p4006_p4 = por %p4005_p10, %p4004_p7 }
  0xa0   : > { %p4007_p5 = pnand %p4006_p4, %p4000_p2 }
  0xa2   : > { %4010 = shalt.err (!%p4007_p5)
}
  0xa3   : > { %3554 = dma.hbm_to_vmem [thread:$0]  (!%p4491_p1), %s639_s6, 128, %s642_s1, %s631_s10  }
  0xa4   : > { %s5198_s5 = sld [smem:[#allocation46_spill]]  ;;  %s5199_s30 = smul.u32 192, %s4520_s16 }
  0xa5   : > { %s3132_s7 = sshll.u32 %s4520_s16, 6  ;;  %s4247_s15 = smov [#allocation9]  }
  0xa6   : > { %s669_s3 = scalar_lea.vmem [#allocation9], %s5199_s30  ;;  %s4029_s19 = sshll.u32 %s4247_s15, 4  ;;  %s4030_s19 = int_to_ptr.vmem [resolvable:$false] %s4029_s19 }
  0xa7   : > { %s676_s29 = sshll.u32 %s669_s3, 4  ;;  %s4031_s4 = scalar_lea.vmem %s4030_s19, 6144  ;;  %s677_s29 = int_to_ptr.vmem [resolvable:$true] %s676_s29 }
  0xa8   : > { %s4024_s20 = scalar_lea.vmem %s677_s29, 3072  ;;  %p4032_p13 = scmp.lt.s32.totalorder %s677_s29, %s4030_s19 }
  0xa9   : > { %p4025_p0 = scmp.ne.s32.totalorder %s677_s29, %s4024_s20  ;;  %p4033_p1 = scmp.lt.s32.totalorder %s4031_s4, %s4024_s20 }
  0xaa   : > { %s675_s8 = scalar_lea.hbm %s5198_s5, %s3515_s22 }
  0xab   : > { %p4027_p9 = pnand %p4025_p0, %p4553_p11  ;;  %p4034_p2 = por %p4033_p1, %p4032_p13 }
  0xad   : > { %p4028_p6 = pneg %p4027_p9 }
  0xaf   : > { %p4035_p7 = pnand %p4034_p2, %p4028_p6 }
  0xb1   : > { %4038 = shalt.err (!%p4035_p7)
}
  0xb2   : > { %s4248_s10 = smov 192   ;;  %s4249_s22 = smov 12  }
  0xb3   : > { %s5200_s16 = scalar_lea.sflag [#allocation8], %s4496_s13  ;;  %s3284_s6 = sshll.u32 %s4227_s27, 10 }
  0xb4   : > { %3560 = dma.hbm_to_vmem [thread:$0]  (!%p4505_p3), %s675_s8, 3072, %s677_s29, %s5200_s16, %s4248_s10, %s4248_s10, %s4249_s22  }
  0xb5   : > { %s5201_s14 = sld [smem:[#allocation48_spill]]  ;;  %s709_s30 = scalar_lea.vmem [#allocation12], %s3132_s7 }
  0xb6   : > { %s716_s3 = sshll.u32 %s709_s30, 4  ;;  %s4250_s15 = smov [#allocation12]   ;;  %s717_s3 = int_to_ptr.vmem [resolvable:$true] %s716_s3 }
  0xb7   : > { %s4052_s20 = scalar_lea.vmem %s717_s3, 1024  ;;  %s4057_s19 = sshll.u32 %s4250_s15, 4  ;;  %s4058_s19 = int_to_ptr.vmem [resolvable:$false] %s4057_s19 }
  0xb8   : > { %p4053_p10 = scmp.ne.s32.totalorder %s717_s3, %s4052_s20  ;;  %s4059_s4 = scalar_lea.vmem %s4058_s19, 2048 }
  0xb9   : > { %p4060_p0 = scmp.lt.s32.totalorder %s717_s3, %s4058_s19  ;;  %p4061_p9 = scmp.lt.s32.totalorder %s4059_s4, %s4052_s20 }
  0xba   : > { %p4055_p4 = pnand %p4053_p10, %p4553_p11 }
  0xbb   : > { %s715_s5 = scalar_lea.hbm %s5201_s14, %s3284_s6  ;;  %p4062_p6 = por %p4061_p9, %p4060_p0 }
  0xbc   : > { %p4056_p5 = pneg %p4055_p4 }
  0xbe   : > { %p4063_p13 = pnand %p4062_p6, %p4056_p5 }
  0xc0   : > { %4066 = shalt.err (!%p4063_p13)
}
  0xc1   : > { %s5202_s8 = scalar_lea.sflag [#allocation11], %s4496_s13  ;;  %s4080_s29 = scalar_lea.vmem %s4590_s23, 4096 }
  0xc2   : > { %3566 = dma.hbm_to_vmem [thread:$0]  (!%p4505_p3), %s715_s5, 1024, %s717_s3, %s5202_s8, %s5194_s24, %s5194_s24, %s5193_s12  }
  0xc3   : > { %p4081_p1 = scmp.ne.s32.totalorder %s4590_s23, %s4080_s29  ;;  %s4251_s7 = smov [#allocation15]  }
  0xc4   : > { %s4085_s10 = sshll.u32 %s4251_s7, 4  ;;  %s4086_s10 = int_to_ptr.vmem [resolvable:$false] %s4085_s10 }
  0xc5   : > { %p4083_p2 = pnand %p4081_p1, %p4553_p11  ;;  %s4087_s22 = scalar_lea.vmem %s4086_s10, 8192 }
  0xc6   : > { %p4088_p10 = scmp.lt.s32.totalorder %s4590_s23, %s4086_s10  ;;  %p4089_p4 = scmp.lt.s32.totalorder %s4087_s22, %s4080_s29 }
  0xc7   : > { %p4084_p7 = pneg %p4083_p2 }
  0xc8   : > { %p4090_p5 = por %p4089_p4, %p4088_p10 }
  0xca   : > { %p4091_p0 = pnand %p4090_p5, %p4084_p7 }
  0xcc   : > { %4094 = shalt.err (!%p4091_p0)
}
  0xcd   : > { %s5203_s16 = scalar_lea.sflag [#allocation14], %s4496_s13  ;;  %p5204_p11 = scmp.ne.s32.totalorder %s5166_s0, 0 }
  0xce   : > { %3572 = dma.hbm_to_vmem [thread:$0]  (!%p4505_p3), %s4586_s17, 4096, %s4590_s23, %s5203_s16, %s5194_s24, %s5194_s24, %s5193_s12  }
  0xcf   : > { %813 = sbr.rel (%p5204_p11) target bundleno = 3802 (0xeda), region = 100  ;;  %s4657_s9 = sand.u32 (!%p5204_p11), 1, %s4211_s2  }
  0xd0   : > { %s3142_s6 = sshll.u32 (!%p5204_p11), %s4657_s9, 3  ;;  %s816_s1 = scalar_lea.sflag (!%p5204_p11), [#allocation5], %s4657_s9 }
  0xd1   : > { %s4661_s26 = scalar_lea.vmem (!%p5204_p11), [#allocation4], %s3142_s6 }
  0xd4   : > { %4166 = dma.done.wait (%p4470_p12), %s816_s1, 128  }
  0xd5   : > { %4168 = vsyncadd (%p4470_p12), %s816_s1, 4294967168  ;;  %s5205_s13 = sld [smem:[#allocation36_spill]] }
  0xdb   : > { %s824_s0 = sand.u32 1, %s5205_s13  }
  0xdc   : > { %s825_s17 = scalar_lea.sflag [#allocation8], %s824_s0 }
  0xdd   : > { %4170 = dma.done.wait (%p4470_p12), %s825_s17, 16  }
  0xde   : > { %4172 = vsyncadd (%p4470_p12), %s825_s17, 4294967280  ;;  %s5206_s12 = sld [smem:[#allocation27_spill]] }
  0xdf   : > { %s5207_s24 = sld [smem:[#allocation37_spill]] }
  0xe4   : > { %s834_s21 = sand.u32 1, %s5206_s12  }
  0xe5   : > { %s3518_s14 = smul.u32 192, %s834_s21  ;;  %p5208_p3 = scmp.ne.s32.totalorder %s5207_s24, 0 }
  0xe7   : > { %s4674_s5 = scalar_lea.vmem [#allocation9], %s3518_s14 }
  0xe8   : > { %4174 = dma.done.wait (%p5208_p3), %s825_s17, 3072  }
  0xe9   : > { %4176 = vsyncadd (%p5208_p3), %s825_s17, 4294964224  ;;  %s3519_s30 = smul.u32 3, %s834_s21  ;;  %s842_s3 = scalar_lea.sflag [#allocation11], %s824_s0 }
  0xeb   : > { %s4680_s20 = scalar_lea.vmem [#allocation10], %s3519_s30 }
  0xec   : > { %4178 = dma.done.wait (%p5208_p3), %s842_s3, 1072  }
  0xed   : > { %4180 = vsyncadd (%p5208_p3), %s842_s3, 4294966224  ;;  %s3143_s11 = sshll.u32 %s834_s21, 6  ;;  %s3144_s15 = sshll.u32 %s834_s21, 8 }
  0xee   : > { %s4686_s19 = scalar_lea.vmem [#allocation12], %s3143_s11  ;;  %s860_s4 = scalar_lea.sflag [#allocation14], %s824_s0 }
  0xef   : > { %s4688_s8 = scalar_lea.vmem [#allocation13], %s3144_s15 }
  0xf0   : > { %4182 = dma.done.wait (%p5208_p3), %s860_s4, 8192  }
  0xf1   : > { %4184 = vsyncadd (%p5208_p3), %s860_s4, 4294959104  ;;  %s4694_s29 = scalar_lea.vmem [#allocation15], %s3144_s15  ;;  %p5209_p12 = scmp.eq.s32.totalorder %s5205_s13, 0 }
  0xf3   : > { %4186 = dma.done.wait (%p5209_p12), [#allocation17], 2048   ;;  %p5210_p9 = pmov %p5209_p12 }
  0xf4   : > { %s5211_s7 = sld [smem:[#allocation31_spill]]  ;;  %s986_s24 = scalar_lea.vmem [#allocation19], %s4657_s9 }
  0xf5   : > { %4188 = vsyncadd (%p5210_p9), [#allocation17], 4294965248  ;;  %s5214_s14 = sld [smem:[#allocation51_spill]] }
  0xf6   : > { %s5215_s4 = sld [smem:[#allocation53_spill]] }
  0xf7   : > { %s5216_s18 = sld [smem:[#allocation55_spill]] }
  0xf8   : > { %s5217_s1 = sld [smem:[#allocation56_spill]] }
  0xf9   : > { %s5218_s17 = sld [smem:[#allocation57_spill]] }
  0xfa   : > { %p987_p6 = scmp.lt.s32.totalorder %s5211_s7, 1  ;;  %p3149_p13 = scmp.ne.s32.totalorder %s5211_s7, 0 }
  0xfc   : > { %s4702_s10 = scalar_select %p987_p6, %s5211_s7, 1 }
  0xfd   : > { %1013 = sbr.rel (%p3149_p13) target bundleno = 260 (0x104), region = 140 }
  0xfe   : > { %s995_s30 = scalar_lea.vmem %s5214_s14, %s4702_s10  ;;  %s3148_s3 = sshll.u32 %s4702_s10, 2 }
  0xff   : > { %s4720_s22 = scalar_lea.vmem %s5215_s4, %s3148_s3  ;;  %s1002_s28 = scalar_lea.vmem %s5216_s18, %s4702_s10 }
 0x100   : > { %s1005_s25 = scalar_lea.vmem %s5217_s1, %s4702_s10  ;;  %s1008_s12 = scalar_lea.vmem %s5218_s17, %s4702_s10 }
 0x102   : > { %v1014_v0 = vld [vmem:[%s4661_s26] sm:$0xff] }
 0x103   : > { %1015 = vst [vmem:[#allocation2] sm:$0xff] %v1014_v0 }
 0x104 PF: > { %v3687_v2 = vld [vmem:[%s4674_s5 + $0xac] ss:$12 sps:$4 sm:$0xff]   ;;  %v3689_v3 = vld [vmem:[%s4674_s5 + $0xa8] ss:$12 sps:$4 sm:$0xff]   ;;  %v4252_v4 = vmov 0.0   ;;  %v4253_v23 = vmov 0   ;;  %v1081_v42 = vlaneseq }
 0x105   : > { %3386 = vmatprep.subr.bf16.mxu1 %v4252_v4  ;;  %v3690_v5 = vld [vmem:[%s4674_s5 + $0xb0] ss:$12 sps:$4 sm:$0xff]   ;;  %v3691_v6 = vld [vmem:[%s4674_s5 + $0x94] ss:$12 sps:$4 sm:$0xff]   ;;  %1224 = vmatprep.subr.bf16.mxu0 %v3687_v2  ;;  %v3694_v8 = vld [vmem:[%s4674_s5 + $0x98] ss:$12 sps:$4 sm:$0xff]  }
 0x106   : > { %v3693_v7 = vld [vmem:[%s4674_s5 + $0x90] ss:$12 sps:$4 sm:$0xff]   ;;  %1225 = vmatpush1.bf16.msra.mxu0 %v3689_v3  ;;  %3387 = vmatpush3.bf16.msra.mxu1 %v3690_v5  ;;  %v3697_v14 = vld [vmem:[%s4674_s5 + $0x78] ss:$12 sps:$4 sm:$0xff]   ;;  %v3698_v15 = vld [vmem:[%s4674_s5 + $0x80] ss:$12 sps:$4 sm:$0xff]  }
 0x107   : > { %1226 = vmatprep.subr.bf16.mxu0 %v3691_v6  ;;  %3388 = vmatprep.subr.bf16.mxu1 %v4252_v4  ;;  %v3695_v13 = vld [vmem:[%s4674_s5 + $0x7c] ss:$12 sps:$4 sm:$0xff]   ;;  %v3699_v16 = vld [vmem:[%s4674_s5 + $0x64] ss:$12 sps:$4 sm:$0xff]   ;;  %v3701_v17 = vld [vmem:[%s4674_s5 + $0x60] ss:$12 sps:$4 sm:$0xff]  }
 0x108   : > { %v3702_v18 = vld [vmem:[%s4674_s5 + $0x68] ss:$12 sps:$4 sm:$0xff]   ;;  %v3703_v19 = vld [vmem:[%s4674_s5 + $0x4c] ss:$12 sps:$4 sm:$0xff]   ;;  %v3706_v21 = vld [vmem:[%s4674_s5 + $0x50] ss:$12 sps:$4 sm:$0xff]   ;;  %1256 = vmatprep.mubr.bf16.mxu0 %v4253_v23 }
 0x109   : > { %v3705_v20 = vld [vmem:[%s4674_s5 + $0x48] ss:$12 sps:$4 sm:$0xff]   ;;  %vm4254_vm0 = vmmov 0   ;;  %v3709_v24 = vld [vmem:[%s4674_s5 + $0x30] ss:$12 sps:$4 sm:$0xff]   ;;  %s5219_s26 = sld [smem:[#allocation50_spill]] }
 0x10a   : > { %v4737_v1 = vld [vmem:[#allocation2] sm:$0xff]  ;;  %1227 = vmatpush1.bf16.msra.mxu0 %v3693_v7  ;;  %3389 = vmatpush3.bf16.msra.mxu1 %v3694_v8  ;;  %v4792_v43 = vshrl.u32 %v1081_v42, 7  ;;  %vm1308_vm1 = vcmask 261120   ;;  %s4256_s21 = smov 32   ;;  %vm1379_vm2 = vcmask 1043456   ;;  %s5222_s14 = scalar_lea.vmem [#allocation7], %s4657_s9 }
 0x10b   : > { %1020 = vadd.xlane.f32.xlu0 %v4737_v1  ;;  %3390 = vmatprep.subr.bf16.mxu1 %v4252_v4  ;;  %v3707_v22 = vld [vmem:[%s4674_s5 + $0x34] ss:$12 sps:$4 sm:$0xff]   ;;  %v3710_v25 = vld [vmem:[%s4674_s5 + $0x38] ss:$12 sps:$4 sm:$0xff]   ;;  %v3711_v26 = vld [vmem:[%s4674_s5 + $0x1c] ss:$12 sps:$4 sm:$0xff]  }
 0x10c   : > { %1228 = vmatprep.subr.bf16.mxu0 %v3695_v13  ;;  %3402 = vmatprep.mubr.msk.bf16.mxu1 %vm4254_vm0, %v4252_v4  ;;  %v3713_v27 = vld [vmem:[%s4674_s5 + $0x18] ss:$12 sps:$4 sm:$0xff]   ;;  %v3714_v28 = vld [vmem:[%s4674_s5 + $0x20] ss:$12 sps:$4 sm:$0xff]   ;;  %v3718_v31 = vld [vmem:[%s4674_s5 + $0x8] ss:$12 sps:$4 sm:$0xff]  }
 0x10d   : > { %v3715_v29 = vld [vmem:[%s4674_s5 + $0x4] ss:$12 sps:$4 sm:$0xff]   ;;  %v3717_v30 = vld [vmem:[%s4674_s5] ss:$12 sps:$4 sm:$0xff]   ;;  %v1087_v44 = vsub.s32 1, %v4792_v43  ;;  %v1091_v46 = vsub.s32 2, %v4792_v43 }
 0x10e   : > { %1229 = vmatpush1.bf16.msra.mxu0 %v3697_v14  ;;  %3391 = vmatpush3.bf16.msra.mxu1 %v3698_v15  ;;  %v3151_v38 = vld [vmem:[%s995_s30] ss:$0 sm:$0xff]  ;;  %v1083_v50 = vsub.s32 0, %v4792_v43  ;;  %vm1363_vm3 = vcmask 64512   ;;  %s4257_s30 = smov 64   ;;  %vm1424_vm4 = vcmask 257024  }
 0x10f   : > { %3392 = vmatprep.subr.bf16.mxu1 %v4252_v4  ;;  %1230 = vmatprep.subr.bf16.mxu0 %v3699_v16  ;;  %s5220_s23 = scalar_lea.vmem %s5219_s26, %s4702_s10  ;;  %v1079_v45 = vld [vmem:[%s4680_s20] sm:$0x7]  ;;  %s4255_s20 = smov 96   ;;  %vm1548_vm5 = vcmask 519424   ;;  %vm1669_vm6 = vcmask 781824   ;;  %vm1790_vm7 = vcmask 1044224  }
 0x110   : > { %v3150_v36 = vld [vmem:[%s5220_s23] ss:$0 sm:$0xff]  ;;  %v1088_v47 = vrot.slane %v1079_v45, %v1087_v44  ;;  %v1092_v53 = vrot.slane %v1079_v45, %v1091_v46  ;;  %v1084_v57 = vrot.slane %v1079_v45, %v1083_v50  ;;  %s5223_s11 = sld [smem:[#allocation49_spill]] }
 0x111   : > { %v4818_v6 = vld [vmem:[%s5222_s14] ss:$0 sm:$0xff] }
 0x112   : > { %1231 = vmatpush1.bf16.msra.mxu0 %v3701_v17  ;;  %3393 = vmatpush3.bf16.msra.mxu1 %v3702_v18 }
 0x113   : > { %1232 = vmatprep.subr.bf16.mxu0 %v3703_v19  ;;  %3394 = vmatprep.subr.bf16.mxu1 %v4252_v4 }
 0x116   : > { %1233 = vmatpush1.bf16.msra.mxu0 %v3705_v20  ;;  %3395 = vmatpush3.bf16.msra.mxu1 %v3706_v21  ;;  %s5224_s15 = scalar_lea.vmem %s5223_s11, %s4702_s10 }
 0x117   : > { %1234 = vmatprep.subr.bf16.mxu0 %v3707_v22  ;;  %3396 = vmatprep.subr.bf16.mxu1 %v4252_v4 }
 0x11a   : > { %1235 = vmatpush1.bf16.msra.mxu0 %v3709_v24  ;;  %3397 = vmatpush3.bf16.msra.mxu1 %v3710_v25 }
 0x11b   : > { %1236 = vmatprep.subr.bf16.mxu0 %v3711_v26  ;;  %3398 = vmatprep.subr.bf16.mxu1 %v4252_v4 }
 0x11e   : > { %1237 = vmatpush1.bf16.msra.mxu0 %v3713_v27  ;;  %3399 = vmatpush3.bf16.msra.mxu1 %v3714_v28 }
 0x11f   : > { %1238 = vmatprep.subr.bf16.mxu0 %v3715_v29  ;;  %3400 = vmatprep.subr.bf16.mxu1 %v4252_v4 }
 0x122   : > { %1239 = vmatpush1.bf16.msra.mxu0 %v3717_v30  ;;  %3401 = vmatpush3.bf16.msra.mxu1 %v3718_v31 }
 0x123   : > { %3406 = vmatprep.subr.bf16.mxu1 %v4252_v4  ;;  %3430 = vmatprep.subr.bf16.mxu0 %v4252_v4 }
 0x194   : > { %v1021_v9 = vpop.xlane.xlu0 %1020 }
 0x195   : > { %v1023_v10 = vmul.f32 0.0078125, %v1021_v9 }
 0x197   : > { %v1024_v11 = vsub.f32 %v4737_v1, %v1023_v10 }
 0x199   : > { %v1025_v12 = vmul.f32 %v1024_v11, %v1024_v11 }
 0x19b   : > { %1026 = vadd.xlane.f32.xlu0 %v1025_v12 }
 0x224   : > { %v1027_v32 = vpop.xlane.xlu0 %1026 }
 0x225   : > { %v1028_v33 = vmul.f32 0.0078125, %v1027_v32 }
 0x227   : > { %v1029_v34 = vadd.f32 1e-05, %v1028_v33 }
 0x229   : > { %3807 = vrsqrt.f32 %v1029_v34 }
 0x236   : > { %v3808_v35 = vpop.eup %3807 }
 0x237   : > { %v1031_v37 = vmul.f32 %v3808_v35, %v1024_v11 }
 0x239   : > { %v1038_v39 = vmul.f32 %v3150_v36, %v1031_v37 }
 0x23b   : > { %v1045_v40 = vadd.f32 %v3151_v38, %v1038_v39 }
 0x23d   : > { %v1046_v41 = vpack.c.bf16 %v1045_v40, %v1045_v40 }
 0x23f   : > { %1257 = vmatmul.mubr.bf16.vlgmr.msra.gmra.mxu0 %v1046_v41  ;;  %3403 = vmatmul.mubr.bf16.vlgmr.msra.gmra.mxu1 %v1046_v41 }
 0x240   : > { %3408 = vmatprep.mubr.msk.bf16.mxu1 %vm4254_vm0, %v4252_v4  ;;  %3432 = vmatprep.mubr.msk.bf16.mxu0 %vm4254_vm0, %v4252_v4 }
 0x2ff   : > { %v1258_v48 = vpop.f32.mrf.mxu0  ;;  %v1299_v49 = vpop.f32.mrf.mxu1 }
 0x300   : > { %v1300_v61 = vadd.f32 %v1299_v49, %v1092_v53  ;;  %v1259_v63 = vadd.f32 %v1258_v48, %v1084_v57 }
 0x301   : > { %v1260_v51 = vpop.f32.mrf.mxu0  ;;  %v3404_v52 = vpop.f32.mrf.mxu1 }
 0x302   : > { %v1261_v54 = vadd.f32 %v1260_v51, %v1088_v47  ;;  %v4807_v0 = vpack.c.bf16 %v1300_v61, %v1300_v61  ;;  %v1305_v2 = vpack.c.bf16 %v1259_v63, %v1259_v63 }
 0x303   : > { %v1262_v55 = vpop.f32.mrf.mxu0  ;;  %v1302_v56 = vpop.f32.mrf.mxu1 }
 0x304   : > { %v1306_v58 = vpack.c.bf16 %v1261_v54, %v1261_v54  ;;  %v1381_v3 = vsel %vm1379_vm2, %v4807_v0, 0 }
 0x305   : > { %v1263_v59 = vpop.f32.mrf.mxu0  ;;  %v3405_v60 = vpop.f32.mrf.mxu1 }
 0x306   : > { %1430 = vrot.lane.b32.xlu0 %v1306_v58, %s4255_s20  ;;  %v1313_v62 = vsel %vm1308_vm1, %v1306_v58, 0 }
 0x307   : > { %3407 = vmatpush3.bf16.xpose.msra.mxu1 %v1313_v62 }
 0x308   : > { %3412 = vmatprep.subr.bf16.mxu1 %v4252_v4 }
 0x30a   : > { %1673 = vrot.lane.b32.xlu0 %v1306_v58, %s4256_s21 }
 0x30e   : > { %3409 = vmatmul.mubr.msk.bf16.vlgmr.msra.gmra.mxu1 %vm1308_vm1, %v1305_v2 }
 0x30f   : > { %3413 = vmatpush3.bf16.msra.mxu1 %v1381_v3  ;;  %3414 = vmatprep.mubr.msk.bf16.mxu1 %vm4254_vm0, %v4252_v4 }
 0x310   : > { %3418 = vmatprep.subr.bf16.mxu1 %v4252_v4 }
 0x378   : > { %v1431_v20 = vpop.permute.xlu0 %1430 }
 0x379   : > { %v1436_v30 = vsel %vm1308_vm1, %v1431_v20, 0 }
 0x37c   : > { %v1674_v25 = vpop.permute.xlu0 %1673 }
 0x37d   : > { %v1679_v28 = vsel %vm1308_vm1, %v1674_v25, 0 }
 0x3ce   : > { %v1349_v5 = vpop.f32.mrf.mxu1 }
 0x3cf   : > { %v1355_v7 = vmul.f32 0.17677669, %v1349_v5 }
 0x3d0   : > { %v3410_v8 = vpop.f32.mrf.mxu1 }
 0x3d1   : > { %v1362_v9 = vadd.f32 %v4818_v6, %v1355_v7 }
 0x3d2   : > { %v1352_v10 = vpop.f32.mrf.mxu1 }
 0x3d3   : > { %v1364_v11 = vsel %vm1363_vm3, %v1362_v9, -inf }
 0x3d4   : > { %1365 = vmax.xlane.f32.xlu1 %v1364_v11  ;;  %v3411_v12 = vpop.f32.mrf.mxu1 }
 0x45d   : > { %v1366_v13 = vpop.xlane.xlu1 %1365 }
 0x45e   : > { %v1367_v14 = vsub.f32 %v1362_v9, %v1366_v13 }
 0x460   : > { %v1368_v15 = vmul.f32 1.442695, %v1367_v14 }
 0x462   : > { %3809 = vpow2.f32 %v1368_v15 }
 0x46f   : > { %v3810_v16 = vpop.eup %3809 }
 0x470   : > { %v1370_v17 = vsel %vm1363_vm3, %v3810_v16, 0.0 }
 0x471   : > { %1371 = vadd.xlane.f32.xlu1 %v1370_v17 }
 0x482   : > { %1427 = vrot.lane.b32.xlu1 %v1305_v2, %s4255_s20 }
 0x486   : > { %1552 = vrot.lane.b32.xlu1 %v1306_v58, %s4257_s30 }
 0x48a   : > { %1550 = vrot.lane.b32.xlu1 %v1305_v2, %s4257_s30 }
 0x48e   : > { %1671 = vrot.lane.b32.xlu1 %v1305_v2, %s4256_s21 }
 0x4fa   : > { %v1372_v18 = vpop.xlane.xlu1 %1371 }
 0x4fb   : > { %3811 = vrcp.f32 %v1372_v18 }
 0x4fe   : > { %v1428_v19 = vpop.permute.xlu1 %1427 }
 0x502   : > { %v1553_v21 = vpop.permute.xlu1 %1552 }
 0x503   : > { %v1558_v22 = vsel %vm1308_vm1, %v1553_v21, 0 }
 0x504   : > { %3431 = vmatpush3.bf16.xpose.msra.mxu0 %v1558_v22 }
 0x505   : > { %3442 = vmatprep.subr.bf16.mxu0 %v4252_v4 }
 0x506   : > { %v1551_v27 = vpop.permute.xlu1 %1550 }
 0x508   : > { %v3812_v24 = vpop.eup %3811 }
 0x509   : > { %v1374_v26 = vmul.f32 %v3812_v24, %v3810_v16 }
 0x50a   : > { %v1672_v31 = vpop.permute.xlu1 %1671 }
 0x50b   : > { %3433 = vmatmul.mubr.msk.bf16.vlgmr.msra.gmra.mxu0 %vm1308_vm1, %v1551_v27  ;;  %v1375_v29 = vpack.c.bf16 %v1374_v26, %v1374_v26 }
 0x50c   : > { %3443 = vmatpush3.bf16.xpose.msra.mxu0 %v1679_v28  ;;  %3444 = vmatprep.mubr.msk.bf16.mxu0 %vm4254_vm0, %v4252_v4 }
 0x50d   : > { %3415 = vmatmul.mubr.msk.bf16.vlgmr.msra.gmra.mxu1 %vm1363_vm3, %v1375_v29  ;;  %3454 = vmatprep.subr.bf16.mxu0 %v4252_v4 }
 0x50e   : > { %3419 = vmatpush3.bf16.xpose.msra.mxu1 %v1436_v30  ;;  %3420 = vmatprep.mubr.msk.bf16.mxu1 %vm4254_vm0, %v4252_v4 }
 0x50f   : > { %3424 = vmatprep.subr.bf16.mxu1 %v4252_v4 }
 0x513   : > { %3445 = vmatmul.mubr.msk.bf16.vlgmr.msra.gmra.mxu0 %vm1308_vm1, %v1672_v31 }
 0x514   : > { %3470 = vmatprep.mubr.msk.bf16.mxu0 %vm4254_vm0, %v4252_v4 }
 0x515   : > { %3421 = vmatmul.mubr.msk.bf16.vlgmr.msra.gmra.mxu1 %vm1308_vm1, %v1428_v19 }
 0x516   : > { %3426 = vmatprep.mubr.msk.bf16.mxu1 %vm4254_vm0, %v4252_v4 }
 0x5cb   : > { %v1594_v32 = vpop.f32.mrf.mxu0 }
 0x5cc   : > { %v1600_v33 = vmul.f32 0.17677669, %v1594_v32 }
 0x5cd   : > { %v1417_v34 = vpop.f32.mrf.mxu1  ;;  %v3434_v35 = vpop.f32.mrf.mxu0 }
 0x5ce   : > { %v1423_v36 = vpack.c.bf16 %v1417_v34, %v1417_v34  ;;  %v1601_v37 = vadd.f32 %v4818_v6, %v1600_v33  ;;  %v3719_v34 = vld [vmem:[%s4686_s19 + $0x38] sm:$0xff]   ;;  %v3720_v35 = vld [vmem:[%s4686_s19 + $0x30] sm:$0xff]  }
 0x5cf   : > { %v3416_v38 = vpop.f32.mrf.mxu1  ;;  %v1597_v39 = vpop.f32.mrf.mxu0  ;;  %3455 = vmatpush3.bf16.msra.mxu0 %v3719_v34  ;;  %v3757_v34 = vld [vmem:[%s4688_s8 + $0x40] ss:$16 sps:$4 sm:$0xff]  }
 0x5d0   : > { %1425 = vst.msk [vmem:[#allocation3] sm:$0xf] %vm1424_vm4, %v1423_v36  ;;  %v1602_v40 = vsel %vm1363_vm3, %v1601_v37, -inf  ;;  %3456 = vmatprep.subr.bf16.mxu0 %v4252_v4  ;;  %v3721_v36 = vld [vmem:[%s4686_s19 + $0x28] sm:$0xff]   ;;  %v3723_v38 = vld [vmem:[%s4686_s19 + $0x18] sm:$0xff]  }
 0x5d1   : > { %1603 = vmax.xlane.f32.xlu1 %v1602_v40  ;;  %v1420_v41 = vpop.f32.mrf.mxu1  ;;  %v3435_v42 = vpop.f32.mrf.mxu0  ;;  %v3724_v40 = vld [vmem:[%s4686_s19 + $0x10] sm:$0xff]  }
 0x5d3   : > { %v3417_v45 = vpop.f32.mrf.mxu1  ;;  %v1715_v47 = vpop.f32.mrf.mxu0  ;;  %3457 = vmatpush3.bf16.msra.mxu0 %v3720_v35  ;;  %v3760_v35 = vld [vmem:[%s4688_s8 + $0x48] ss:$16 sps:$4 sm:$0xff]  }
 0x5d4   : > { %v1721_v51 = vmul.f32 0.17677669, %v1715_v47  ;;  %3458 = vmatprep.subr.bf16.mxu0 %v4252_v4 }
 0x5d5   : > { %v1472_v48 = vpop.f32.mrf.mxu1  ;;  %v3446_v49 = vpop.f32.mrf.mxu0 }
 0x5d6   : > { %v1478_v52 = vmul.f32 0.17677669, %v1472_v48  ;;  %v1722_v59 = vadd.f32 %v4818_v6, %v1721_v51  ;;  %v3725_v48 = vld [vmem:[%s4686_s19 + $0x8] sm:$0xff]   ;;  %v3726_v51 = vld [vmem:[%s4686_s19] sm:$0xff]  }
 0x5d7   : > { %v3422_v53 = vpop.f32.mrf.mxu1  ;;  %v1718_v54 = vpop.f32.mrf.mxu0  ;;  %3459 = vmatpush3.bf16.msra.mxu0 %v3721_v36  ;;  %v3765_v36 = vld [vmem:[%s4688_s8 + $0x24] ss:$16 sps:$4 sm:$0xff]  }
 0x5d8   : > { %v1479_v55 = vadd.f32 %v4818_v6, %v1478_v52  ;;  %v1723_v61 = vsel %vm1363_vm3, %v1722_v59, -inf  ;;  %3460 = vmatprep.subr.bf16.mxu0 %v4252_v4 }
 0x5d9   : > { %v1475_v56 = vpop.f32.mrf.mxu1  ;;  %v3447_v57 = vpop.f32.mrf.mxu0 }
 0x5da   : > { %v1480_v58 = vsel %vm1363_vm3, %v1479_v55, -inf }
 0x5db   : > { %1481 = vmax.xlane.f32.xlu0 %v1480_v58  ;;  %v3423_v60 = vpop.f32.mrf.mxu1 }
 0x5df   : > { %1724 = vmax.xlane.f32.xlu0 %v1723_v61 }
 0x65a   : > { %v1604_v62 = vpop.xlane.xlu1 %1603 }
 0x65b   : > { %v1605_v63 = vsub.f32 %v1601_v37, %v1604_v62  ;;  %v3722_v37 = vld [vmem:[%s4686_s19 + $0x20] sm:$0xff]  }
 0x65c   : > { %3461 = vmatpush3.bf16.msra.mxu0 %v3722_v37  ;;  %v3768_v37 = vld [vmem:[%s4688_s8 + $0x2c] ss:$16 sps:$4 sm:$0xff]  }
 0x65d   : > { %v1606_v2 = vmul.f32 1.442695, %v1605_v63  ;;  %3462 = vmatprep.subr.bf16.mxu0 %v4252_v4 }
 0x65f   : > { %3813 = vpow2.f32 %v1606_v2 }
 0x660   : > { %3463 = vmatpush3.bf16.msra.mxu0 %v3723_v38  ;;  %v3763_v38 = vld [vmem:[%s4688_s8 + $0x20] ss:$16 sps:$4 sm:$0xff]  }
 0x661   : > { %3464 = vmatprep.subr.bf16.mxu0 %v4252_v4 }
 0x664   : > { %v1482_v3 = vpop.xlane.xlu0 %1481  ;;  %3465 = vmatpush3.bf16.msra.mxu0 %v3724_v40  ;;  %v3771_v40 = vld [vmem:[%s4688_s8 + $0x4] ss:$16 sps:$4 sm:$0xff]  }
 0x665   : > { %v1483_v5 = vsub.f32 %v1479_v55, %v1482_v3  ;;  %3466 = vmatprep.subr.bf16.mxu0 %v4252_v4  ;;  %v3196_v3 = vld [vmem:[%s5224_s15] ss:$0 sm:$0xff] }
 0x667   : > { %v1484_v7 = vmul.f32 1.442695, %v1483_v5 }
 0x668   : > { %v1725_v8 = vpop.xlane.xlu0 %1724  ;;  %3467 = vmatpush3.bf16.msra.mxu0 %v3725_v48  ;;  %v3776_v48 = vld [vmem:[%s4694_s29 + $0xf8] sm:$0xff]  }
 0x669   : > { %3815 = vpow2.f32 %v1484_v7  ;;  %v1726_v9 = vsub.f32 %v1722_v59, %v1725_v8  ;;  %3468 = vmatprep.subr.bf16.mxu0 %v4252_v4 }
 0x66b   : > { %v1727_v10 = vmul.f32 1.442695, %v1726_v9 }
 0x66c   : > { %v3814_v11 = vpop.eup %3813  ;;  %3469 = vmatpush3.bf16.msra.mxu0 %v3726_v51 }
 0x66d   : > { %3817 = vpow2.f32 %v1727_v10  ;;  %v1608_v6 = vsel %vm1363_vm3, %v3814_v11, 0.0 }
 0x66e   : > { %1609 = vadd.xlane.f32.xlu0 %v1608_v6  ;;  %v3729_v6 = vld [vmem:[%s4688_s8 + $0xe4] ss:$16 sps:$4 sm:$0xff]  }
 0x676   : > { %v3816_v12 = vpop.eup %3815 }
 0x677   : > { %v1486_v13 = vsel %vm1363_vm3, %v3816_v12, 0.0 }
 0x678   : > { %1487 = vadd.xlane.f32.xlu0 %v1486_v13  ;;  %v3735_v13 = vld [vmem:[%s4688_s8 + $0xc4] ss:$16 sps:$4 sm:$0xff]  }
 0x67a   : > { %v3818_v14 = vpop.eup %3817 }
 0x67b   : > { %v1729_v15 = vsel %vm1363_vm3, %v3818_v14, 0.0 }
 0x67c   : > { %1730 = vadd.xlane.f32.xlu1 %v1729_v15  ;;  %v3736_v15 = vld [vmem:[%s4688_s8 + $0xc8] ss:$16 sps:$4 sm:$0xff]  }
 0x68d   : > { %1614 = vrot.lane.b32.xlu1 %v4807_v0, %s4257_s30 }
 0x68e   : > { %1493 = vrot.lane.b32.xlu0 %v4807_v0, %s4255_s20 }
 0x691   : > { %1735 = vrot.lane.b32.xlu1 %v4807_v0, %s4256_s21 }
 0x6f7   : > { %v1610_v16 = vpop.xlane.xlu0 %1609 }
 0x701   : > { %v1488_v17 = vpop.xlane.xlu0 %1487 }
 0x702   : > { %3819 = vrcp.f32 %v1488_v17 }
 0x703   : > { %3821 = vrcp.f32 %v1610_v16 }
 0x705   : > { %v1494_v18 = vpop.permute.xlu0 %1493  ;;  %v1731_v20 = vpop.xlane.xlu1 %1730 }
 0x706   : > { %v1499_v19 = vsel %vm1379_vm2, %v1494_v18, 0  ;;  %3823 = vrcp.f32 %v1731_v20  ;;  %v3741_v20 = vld [vmem:[%s4688_s8 + $0xa4] ss:$16 sps:$4 sm:$0xff]  }
 0x707   : > { %3425 = vmatpush3.bf16.msra.mxu1 %v1499_v19 }
 0x708   : > { %3436 = vmatprep.subr.bf16.mxu1 %v4252_v4 }
 0x709   : > { %v1615_v24 = vpop.permute.xlu1 %1614 }
 0x70a   : > { %v1620_v27 = vsel %vm1379_vm2, %v1615_v24, 0  ;;  %v3742_v24 = vld [vmem:[%s4688_s8 + $0xa8] ss:$16 sps:$4 sm:$0xff]  }
 0x70d   : > { %v1736_v28 = vpop.permute.xlu1 %1735 }
 0x70e   : > { %v1741_v31 = vsel %vm1379_vm2, %v1736_v28, 0  ;;  %v3753_v28 = vld [vmem:[%s4688_s8 + $0x64] ss:$16 sps:$4 sm:$0xff]  }
 0x70f   : > { %v3820_v21 = vpop.eup %3819 }
 0x710   : > { %v1490_v22 = vmul.f32 %v3820_v21, %v3816_v12  ;;  %v3822_v26 = vpop.eup %3821  ;;  %v3732_v12 = vld [vmem:[%s4688_s8 + $0xec] ss:$16 sps:$4 sm:$0xff]  }
 0x711   : > { %v1612_v0 = vmul.f32 %v3822_v26, %v3814_v11  ;;  %v3727_v11 = vld [vmem:[%s4688_s8 + $0xe0] ss:$16 sps:$4 sm:$0xff]   ;;  %2189 = vmatprep.subr.bf16.mxu0 %v3732_v12  ;;  %v3744_v21 = vld [vmem:[%s4688_s8 + $0xac] ss:$16 sps:$4 sm:$0xff]   ;;  %v3747_v26 = vld [vmem:[%s4688_s8 + $0x84] ss:$16 sps:$4 sm:$0xff]  }
 0x712   : > { %v1491_v25 = vpack.c.bf16 %v1490_v22, %v1490_v22  ;;  %v3739_v22 = vld [vmem:[%s4688_s8 + $0xa0] ss:$16 sps:$4 sm:$0xff]   ;;  %v3791_v12 = vld [vmem:[%s4694_s29 + $0x58] sm:$0xff]  }
 0x713   : > { %v1613_v29 = vpack.c.bf16 %v1612_v0, %v1612_v0  ;;  %v3824_v30 = vpop.eup %3823  ;;  %v3750_v0 = vld [vmem:[%s4688_s8 + $0x8c] ss:$16 sps:$4 sm:$0xff]  }
 0x714   : > { %3427 = vmatmul.mubr.msk.bf16.vlgmr.msra.gmra.mxu1 %vm1363_vm3, %v1491_v25  ;;  %v1733_v32 = vmul.f32 %v3824_v30, %v3818_v14  ;;  %v3738_v14 = vld [vmem:[%s4688_s8 + $0xcc] ss:$16 sps:$4 sm:$0xff]   ;;  %v3745_v25 = vld [vmem:[%s4688_s8 + $0x80] ss:$16 sps:$4 sm:$0xff]  }
 0x715   : > { %3437 = vmatpush3.bf16.msra.mxu1 %v1620_v27  ;;  %3438 = vmatprep.mubr.msk.bf16.mxu1 %vm4254_vm0, %v4252_v4  ;;  %v3748_v27 = vld [vmem:[%s4688_s8 + $0x88] ss:$16 sps:$4 sm:$0xff]   ;;  %v3751_v30 = vld [vmem:[%s4688_s8 + $0x60] ss:$16 sps:$4 sm:$0xff]  }
 0x716   : > { %3448 = vmatprep.subr.bf16.mxu1 %v4252_v4  ;;  %v1734_v33 = vpack.c.bf16 %v1733_v32, %v1733_v32  ;;  %v3759_v32 = vld [vmem:[%s4688_s8 + $0x44] ss:$16 sps:$4 sm:$0xff]  }
 0x71c   : > { %3439 = vmatmul.mubr.msk.bf16.vlgmr.msra.gmra.mxu1 %vm1363_vm3, %v1613_v29  ;;  %v3756_v29 = vld [vmem:[%s4688_s8 + $0x6c] ss:$16 sps:$4 sm:$0xff]  }
 0x71d   : > { %3449 = vmatpush3.bf16.msra.mxu1 %v1741_v31  ;;  %3450 = vmatprep.mubr.msk.bf16.mxu1 %vm4254_vm0, %v4252_v4  ;;  %v3754_v31 = vld [vmem:[%s4688_s8 + $0x68] ss:$16 sps:$4 sm:$0xff]  }
 0x71e   : > { %2148 = vmatprep.subr.bf16.mxu1 %v3729_v6  ;;  %v3789_v6 = vld [vmem:[%s4694_s29 + $0x20] sm:$0xff]  }
 0x724   : > { %3451 = vmatmul.mubr.msk.bf16.vlgmr.msra.gmra.mxu1 %vm1363_vm3, %v1734_v33  ;;  %v3762_v33 = vld [vmem:[%s4688_s8 + $0x4c] ss:$16 sps:$4 sm:$0xff]  }
 0x725   : > { %2180 = vmatprep.mubr.bf16.mxu1 %v4253_v23  ;;  %2149 = vmatpush1.bf16.msra.mxu1 %v3727_v11  ;;  %v3788_v11 = vld [vmem:[%s4694_s29 + $0xe0] sm:$0xff]  }
 0x726   : > { %2150 = vmatprep.subr.bf16.mxu1 %v3735_v13  ;;  %v3792_v13 = vld [vmem:[%s4694_s29 + $0xd8] sm:$0xff]  }
 0x7d4   : > { %v1535_v39 = vpop.f32.mrf.mxu1 }
 0x7d5   : > { %v3287_v41 = vpack.c.bf16 %v1535_v39, %v1535_v39  ;;  %v3766_v39 = vld [vmem:[%s4688_s8 + $0x28] ss:$16 sps:$4 sm:$0xff]  }
 0x7d6   : > { %v3428_v42 = vpop.f32.mrf.mxu1 }
 0x7d7   : > { %1545 = vrot.lane.b32.xlu1 %v3287_v41, %s4256_s21  ;;  %v3774_v41 = vld [vmem:[%s4688_s8 + $0xc] ss:$16 sps:$4 sm:$0xff]   ;;  %v3769_v42 = vld [vmem:[%s4688_s8] ss:$16 sps:$4 sm:$0xff]  }
 0x7d8   : > { %v1538_v45 = vpop.f32.mrf.mxu1 }
 0x7d9   : > { %v3772_v45 = vld [vmem:[%s4688_s8 + $0x8] ss:$16 sps:$4 sm:$0xff]  }
 0x7da   : > { %v3429_v47 = vpop.f32.mrf.mxu1 }
 0x7db   : > { %v3775_v47 = vld [vmem:[%s4694_s29 + $0x78] sm:$0xff]  }
 0x7dc   : > { %v1656_v49 = vpop.f32.mrf.mxu1 }
 0x7dd   : > { %v3288_v52 = vpack.c.bf16 %v1656_v49, %v1656_v49 }
 0x7de   : > { %v3440_v53 = vpop.f32.mrf.mxu1 }
 0x7df   : > { %1666 = vrot.lane.b32.xlu0 %v3288_v52, %s4257_s30 }
 0x7e0   : > { %v1659_v54 = vpop.f32.mrf.mxu1 }
 0x7e1   : > { %v3197_v54 = vld [vmem:[%s1005_s25] ss:$0 sm:$0xff] }
 0x7e2   : > { %v3441_v55 = vpop.f32.mrf.mxu1 }
 0x7e4   : > { %v1777_v56 = vpop.f32.mrf.mxu1 }
 0x7e5   : > { %v3289_v57 = vpack.c.bf16 %v1777_v56, %v1777_v56  ;;  %v3198_v56 = vld [vmem:[%s1008_s12] ss:$0 sm:$0xff] }
 0x7e6   : > { %v3452_v58 = vpop.f32.mrf.mxu1 }
 0x7e7   : > { %1787 = vrot.lane.b32.xlu1 %v3289_v57, %s4255_s20 }
 0x7e8   : > { %v1780_v59 = vpop.f32.mrf.mxu1 }
 0x7e9   : > { %v3777_v59 = vld [vmem:[%s4694_s29 + $0x38] sm:$0xff]  }
 0x7ea   : > { %v3453_v60 = vpop.f32.mrf.mxu1 }
 0x7eb   : > { %v3778_v60 = vld [vmem:[%s4694_s29 + $0xb8] sm:$0xff]  }
 0x849   : > { %v1546_v61 = vpop.permute.xlu1 %1545 }
 0x84a   : > { %1549 = vst.msk [vmem:[#allocation3] sm:$0xf] %vm1548_vm5, %v1546_v61 }
 0x851   : > { %v1667_v62 = vpop.permute.xlu0 %1666 }
 0x852   : > { %1670 = vst.msk [vmem:[#allocation3] sm:$0xf] %vm1669_vm6, %v1667_v62  ;;  %v3779_v62 = vld [vmem:[%s4694_s29 + $0x70] sm:$0xff]  }
 0x859   : > { %v1788_v4 = vpop.permute.xlu1 %1787 }
 0x85a   : > { %1791 = vst.msk [vmem:[#allocation3] sm:$0xf] %vm1790_vm7, %v1788_v4  ;;  %v3780_v4 = vld [vmem:[%s4694_s29 + $0xf0] sm:$0xff]  }
 0x861   : > { %v1792_v63 = vld [vmem:[#allocation3] sm:$0xf] }
 0x862   : > { %3471 = vmatmul.mubr.bf16.vlgmr.msra.gmra.mxu0 %v1792_v63  ;;  %v3781_v63 = vld [vmem:[%s4694_s29 + $0x30] sm:$0xff]  }
 0x863   : > { %2221 = vmatprep.mubr.bf16.mxu0 %v4253_v23  ;;  %v3730_v23 = vld [vmem:[%s4688_s8 + $0xe8] ss:$16 sps:$4 sm:$0xff]  }
 0x864   : > { %2190 = vmatpush1.bf16.msra.mxu0 %v3730_v23  ;;  %v3790_v23 = vld [vmem:[%s4694_s29 + $0xa0] sm:$0xff]  }
 0x865   : > { %2191 = vmatprep.subr.bf16.mxu0 %v3738_v14  ;;  %v3793_v14 = vld [vmem:[%s4694_s29 + $0x18] sm:$0xff]  }
 0x868   : > { %2192 = vmatpush1.bf16.msra.mxu0 %v3736_v15  ;;  %v3795_v15 = vld [vmem:[%s4694_s29 + $0x50] sm:$0xff]  }
 0x869   : > { %2193 = vmatprep.subr.bf16.mxu0 %v3744_v21  ;;  %v3801_v21 = vld [vmem:[%s4694_s29 + $0x8] sm:$0xff]  }
 0x86c   : > { %2194 = vmatpush1.bf16.msra.mxu0 %v3742_v24  ;;  %v3803_v24 = vld [vmem:[%s4694_s29 + $0x40] sm:$0xff]  }
 0x86d   : > { %2195 = vmatprep.subr.bf16.mxu0 %v3750_v0  ;;  %v1966_v0 = vld [vmem:[%s4720_s22] sm:$0xf]  ;;  %s5228_s22 = sld [smem:[#allocation31_spill]] }
 0x870   : > { %2196 = vmatpush1.bf16.msra.mxu0 %v3748_v27  ;;  %v3806_v27 = vld [vmem:[%s4694_s29 + $0x80] sm:$0xff]  }
 0x871   : > { %2197 = vmatprep.subr.bf16.mxu0 %v3756_v29  ;;  %v1971_v29 = vrot.slane %v1966_v0, %v1083_v50 }
 0x873   : > { %p3264_p1 = scmp.ne.s32.totalorder %s5228_s22, 1 }
 0x874   : > { %2198 = vmatpush1.bf16.msra.mxu0 %v3754_v31  ;;  %v1975_v31 = vrot.slane %v1966_v0, %v1087_v44  ;;  %s5229_s17 = sld [smem:[#allocation58_spill]] (!%p3264_p1) }
 0x875   : > { %2199 = vmatprep.subr.bf16.mxu0 %v3762_v33  ;;  %s5230_s26 = sld [smem:[#allocation59_spill]] (!%p3264_p1) }
 0x876   : > { %s5231_s7 = sld [smem:[#allocation61_spill]] (!%p3264_p1) }
 0x877   : > { %s5232_s21 = sld [smem:[#allocation63_spill]] (!%p3264_p1) }
 0x878   : > { %2200 = vmatpush1.bf16.msra.mxu0 %v3760_v35 }
 0x879   : > { %2201 = vmatprep.subr.bf16.mxu0 %v3768_v37 }
 0x87c   : > { %2202 = vmatpush1.bf16.msra.mxu0 %v3766_v39 }
 0x87d   : > { %2203 = vmatprep.subr.bf16.mxu0 %v3774_v41 }
 0x880   : > { %2204 = vmatpush1.bf16.msra.mxu0 %v3772_v45 }
 0x881   : > { %3346 = vmatprep.subr.bf16.mxu0 %v3776_v48 }
 0x922   : > { %v1891_v2 = vpop.f32.mrf.mxu0 }
 0x923   : > { %v1897_v5 = vadd.f32 %v1891_v2, %v4737_v1  ;;  %v3733_v1 = vld [vmem:[%s4688_s8 + $0xc0] ss:$16 sps:$4 sm:$0xff]  }
 0x924   : > { %v3472_v7 = vpop.f32.mrf.mxu0  ;;  %2151 = vmatpush1.bf16.msra.mxu1 %v3733_v1  ;;  %v3782_v2 = vld [vmem:[%s4694_s29 + $0xb0] sm:$0xff]   ;;  %v3794_v1 = vld [vmem:[%s4694_s29 + $0x98] sm:$0xff]  }
 0x925   : > { %v4898_v8 = vadd.f32 %v3196_v3, %v1897_v5  ;;  %2152 = vmatprep.subr.bf16.mxu1 %v3741_v20  ;;  %v3783_v3 = vld [vmem:[%s4694_s29 + $0x68] sm:$0xff]  }
 0x926   : > { %v1894_v9 = vpop.f32.mrf.mxu0  ;;  %v3784_v5 = vld [vmem:[%s4694_s29 + $0xe8] sm:$0xff]  }
 0x927   : > { %1908 = vadd.xlane.f32.xlu0 %v4898_v8  ;;  %v3785_v7 = vld [vmem:[%s4694_s29 + $0x28] sm:$0xff]  }
 0x928   : > { %v3473_v10 = vpop.f32.mrf.mxu0  ;;  %2153 = vmatpush1.bf16.msra.mxu1 %v3739_v22  ;;  %v3786_v9 = vld [vmem:[%s4694_s29 + $0xa8] sm:$0xff]  }
 0x929   : > { %2154 = vmatprep.subr.bf16.mxu1 %v3747_v26  ;;  %v3787_v10 = vld [vmem:[%s4694_s29 + $0x60] sm:$0xff]   ;;  %v3800_v20 = vld [vmem:[%s4694_s29 + $0xc8] sm:$0xff]  }
 0x92a   : > { %v3802_v22 = vld [vmem:[%s4694_s29 + $0x88] sm:$0xff]   ;;  %v3805_v26 = vld [vmem:[%s4694_s29] sm:$0xff]  }
 0x92c   : > { %2155 = vmatpush1.bf16.msra.mxu1 %v3745_v25  ;;  %v3804_v25 = vld [vmem:[%s4694_s29 + $0xc0] sm:$0xff]  }
 0x92d   : > { %2156 = vmatprep.subr.bf16.mxu1 %v3753_v28  ;;  %v1982_v28 = vsub.s32 3, %v4792_v43 }
 0x930   : > { %2157 = vmatpush1.bf16.msra.mxu1 %v3751_v30  ;;  %v1979_v30 = vrot.slane %v1966_v0, %v1091_v46 }
 0x931   : > { %2158 = vmatprep.subr.bf16.mxu1 %v3759_v32  ;;  %v1983_v32 = vrot.slane %v1966_v0, %v1982_v28 }
 0x934   : > { %2159 = vmatpush1.bf16.msra.mxu1 %v3757_v34 }
 0x935   : > { %2160 = vmatprep.subr.bf16.mxu1 %v3765_v36 }
 0x938   : > { %2161 = vmatpush1.bf16.msra.mxu1 %v3763_v38 }
 0x939   : > { %2162 = vmatprep.subr.bf16.mxu1 %v3771_v40 }
 0x93c   : > { %2163 = vmatpush1.bf16.msra.mxu1 %v3769_v42 }
 0x93d   : > { %3324 = vmatprep.subr.bf16.mxu1 %v3775_v47 }
 0x9b0   : > { %v1909_v16 = vpop.xlane.xlu0 %1908 }
 0x9b1   : > { %v1910_v17 = vmul.f32 0.0078125, %v1909_v16  ;;  %v3796_v16 = vld [vmem:[%s4694_s29 + $0xd0] sm:$0xff]  }
 0x9b3   : > { %v1911_v18 = vsub.f32 %v4898_v8, %v1910_v17  ;;  %v3797_v17 = vld [vmem:[%s4694_s29 + $0x10] sm:$0xff]  }
 0x9b5   : > { %v1912_v19 = vmul.f32 %v1911_v18, %v1911_v18 }
 0x9b7   : > { %1913 = vadd.xlane.f32.xlu1 %v1912_v19  ;;  %v3799_v19 = vld [vmem:[%s4694_s29 + $0x48] sm:$0xff]  }
 0xa40   : > { %v1914_v49 = vpop.xlane.xlu1 %1913 }
 0xa41   : > { %v1915_v51 = vmul.f32 0.0078125, %v1914_v49 }
 0xa43   : > { %v1916_v52 = vadd.f32 1e-05, %v1915_v51 }
 0xa45   : > { %3825 = vrsqrt.f32 %v1916_v52 }
 0xa52   : > { %v3826_v53 = vpop.eup %3825 }
 0xa53   : > { %v1918_v55 = vmul.f32 %v3826_v53, %v1911_v18  ;;  %v3798_v18 = vld [vmem:[%s4694_s29 + $0x90] sm:$0xff]  }
 0xa55   : > { %v1925_v57 = vmul.f32 %v3197_v54, %v1918_v55 }
 0xa57   : > { %v1932_v58 = vadd.f32 %v3198_v56, %v1925_v57 }
 0xa59   : > { %v1933_v61 = vpack.c.bf16 %v1932_v58, %v1932_v58 }
 0xa5b   : > { %2181 = vmatmul.mubr.bf16.vlgmr.msra.gmra.mxu1 %v1933_v61  ;;  %2222 = vmatmul.mubr.bf16.vlgmr.msra.gmra.mxu0 %v1933_v61 }
 0xa5c   : > { %3325 = vmatpush3.bf16.msra.mxu1 %v3777_v59  ;;  %3347 = vmatpush3.bf16.msra.mxu0 %v3778_v60 }
 0xa5d   : > { %3326 = vmatprep.subr.bf16.mxu1 %v3779_v62  ;;  %3348 = vmatprep.subr.bf16.mxu0 %v3780_v4  ;;  %v3263_v62 = vld [vmem:[%s1002_s28] ss:$0 sm:$0xff] }
 0xa60   : > { %3327 = vmatpush3.bf16.msra.mxu1 %v3781_v63  ;;  %3349 = vmatpush3.bf16.msra.mxu0 %v3782_v2 }
 0xa61   : > { %3328 = vmatprep.subr.bf16.mxu1 %v3783_v3  ;;  %3350 = vmatprep.subr.bf16.mxu0 %v3784_v5 }
 0xa64   : > { %3329 = vmatpush3.bf16.msra.mxu1 %v3785_v7  ;;  %3351 = vmatpush3.bf16.msra.mxu0 %v3786_v9 }
 0xa65   : > { %3330 = vmatprep.subr.bf16.mxu1 %v3787_v10  ;;  %3352 = vmatprep.subr.bf16.mxu0 %v3788_v11 }
 0xa68   : > { %3331 = vmatpush3.bf16.msra.mxu1 %v3789_v6  ;;  %3353 = vmatpush3.bf16.msra.mxu0 %v3790_v23 }
 0xa69   : > { %3332 = vmatprep.subr.bf16.mxu1 %v3791_v12  ;;  %3354 = vmatprep.subr.bf16.mxu0 %v3792_v13 }
 0xa6c   : > { %3333 = vmatpush3.bf16.msra.mxu1 %v3793_v14  ;;  %3355 = vmatpush3.bf16.msra.mxu0 %v3794_v1 }
 0xa6d   : > { %3334 = vmatprep.subr.bf16.mxu1 %v3795_v15  ;;  %3356 = vmatprep.subr.bf16.mxu0 %v3796_v16 }
 0xa70   : > { %3335 = vmatpush3.bf16.msra.mxu1 %v3797_v17  ;;  %3357 = vmatpush3.bf16.msra.mxu0 %v3798_v18 }
 0xa71   : > { %3336 = vmatprep.subr.bf16.mxu1 %v3799_v19  ;;  %3358 = vmatprep.subr.bf16.mxu0 %v3800_v20 }
 0xa74   : > { %3337 = vmatpush3.bf16.msra.mxu1 %v3801_v21  ;;  %3359 = vmatpush3.bf16.msra.mxu0 %v3802_v22 }
 0xa75   : > { %3338 = vmatprep.subr.bf16.mxu1 %v3803_v24  ;;  %3360 = vmatprep.subr.bf16.mxu0 %v3804_v25 }
 0xa78   : > { %3339 = vmatpush3.bf16.msra.mxu1 %v3805_v26  ;;  %3361 = vmatpush3.bf16.msra.mxu0 %v3806_v27 }
 0xb1b   : > { %v2182_v33 = vpop.f32.mrf.mxu1  ;;  %v2223_v34 = vpop.f32.mrf.mxu0 }
 0xb1c   : > { %v2183_v35 = vadd.f32 %v2182_v33, %v1971_v29  ;;  %v2224_v36 = vadd.f32 %v2223_v34, %v1979_v30 }
 0xb1d   : > { %v2184_v37 = vpop.f32.mrf.mxu1  ;;  %v2225_v38 = vpop.f32.mrf.mxu0 }
 0xb1e   : > { %v2185_v39 = vadd.f32 %v2184_v37, %v1975_v31  ;;  %v2226_v40 = vadd.f32 %v2225_v38, %v1983_v32  ;;  %v2230_v41 = vmax.f32 %v2183_v35, 0.0  ;;  %v2232_v42 = vmax.f32 %v2224_v36, 0.0 }
 0xb1f   : > { %v2186_v45 = vpop.f32.mrf.mxu1  ;;  %v2227_v47 = vpop.f32.mrf.mxu0 }
 0xb20   : > { %v2231_v50 = vmax.f32 %v2185_v39, 0.0  ;;  %v2233_v48 = vmax.f32 %v2226_v40, 0.0  ;;  %v2234_v44 = vpack.c.bf16 %v2230_v41, %v2230_v41  ;;  %v2236_v52 = vpack.c.bf16 %v2232_v42, %v2232_v42 }
 0xb21   : > { %v2187_v49 = vpop.f32.mrf.mxu1  ;;  %v2228_v46 = vpop.f32.mrf.mxu0 }
 0xb22   : > { %v2235_v51 = vpack.c.bf16 %v2231_v50, %v2231_v50  ;;  %v2237_v43 = vpack.c.bf16 %v2233_v48, %v2233_v48 }
 0xb24   : > { %2526 = vmatprep.mubr.bf16.mxu1 %v2235_v51  ;;  %2566 = vmatprep.mubr.bf16.mxu0 %v2237_v43 }
 0xb25   : > { %2527 = vmatmul.mubr.bf16.vlgmr.msra.gmra.mxu1 %v2234_v44  ;;  %2567 = vmatmul.mubr.bf16.vlgmr.msra.gmra.mxu0 %v2236_v52 }
 0xbe5   : > { %v3340_v53 = vpop.f32.mrf.mxu1  ;;  %v3362_v54 = vpop.f32.mrf.mxu0 }
 0xbe7   : > { %v3341_v55 = vpop.f32.mrf.mxu1  ;;  %v3363_v56 = vpop.f32.mrf.mxu0 }
 0xbe8   : > { %v3342_v57 = vadd.f32 %v3341_v55, %v3340_v53  ;;  %v3364_v58 = vadd.f32 %v3363_v56, %v3362_v54 }
 0xbe9   : > { %v3343_v59 = vpop.f32.mrf.mxu1  ;;  %v3365_v60 = vpop.f32.mrf.mxu0 }
 0xbea   : > { %v2569_v61 = vadd.f32 %v3364_v58, %v3342_v57 }
 0xbeb   : > { %v3344_v4 = vpop.f32.mrf.mxu1  ;;  %v3366_v63 = vpop.f32.mrf.mxu0 }
 0xbec   : > { %v2574_v2 = vadd.f32 %v2569_v61, %v4898_v8  ;;  %2587 = sbr.rel (%p3264_p1) target bundleno = 3778 (0xec2), region = 144 }
 0xbee   : > { %v2582_v3 = vadd.f32 %v3263_v62, %v2574_v2 }
 0xbf0   : > { %2583 = vst [vmem:[#allocation2] sm:$0xff] %v2582_v3 }
 0xbf1   : > { %vm2590_vm8 = vcmask 1040384   ;;  %v3827_v7 = vld [vmem:[#allocation16 + $0x38] sm:$0xff]   ;;  %v4258_v9 = vmov 0.0   ;;  %v3828_v10 = vld [vmem:[#allocation16 + $0x30] sm:$0xff]   ;;  %v3829_v13 = vld [vmem:[#allocation16 + $0x28] sm:$0xff]   ;;  %vm4259_vm9 = vmmov 0  }
 0xbf2   : > { %v2591_v5 = vsel %vm2590_vm8, %v2582_v3, 0.0  ;;  %3474 = vmatprep.subr.bf16.mxu0 %v4258_v9  ;;  %3494 = vmatprep.subr.bf16.mxu1 %v4258_v9  ;;  %v3830_v14 = vld [vmem:[#allocation16 + $0x20] sm:$0xff]   ;;  %v3831_v1 = vld [vmem:[#allocation16 + $0x18] sm:$0xff]   ;;  %v3832_v15 = vld [vmem:[#allocation16 + $0x10] sm:$0xff]  }
 0xbf3   : > { %2592 = vadd.xlane.f32.xlu0 %v2591_v5  ;;  %3475 = vmatpush3.bf16.msra.mxu0 %v3827_v7  ;;  %v3833_v16 = vld [vmem:[#allocation16 + $0x8] sm:$0xff]   ;;  %v3834_v17 = vld [vmem:[#allocation16] sm:$0xff]   ;;  %v3835_v18 = vld [vmem:[#allocation18 + $0x38] sm:$0xff]  }
 0xbf4   : > { %3476 = vmatprep.subr.bf16.mxu0 %v4258_v9  ;;  %3490 = vmatprep.mubr.msk.bf16.mxu0 %vm4259_vm9, %v4258_v9  ;;  %v3836_v19 = vld [vmem:[#allocation18 + $0x30] sm:$0xff]   ;;  %v3837_v20 = vld [vmem:[#allocation18 + $0x28] sm:$0xff]   ;;  %v2588_v26 = vld [vmem:[%s5229_s17] sm:$0x1] }
 0xbf5   : > { %3510 = vmatprep.mubr.msk.bf16.mxu1 %vm4259_vm9, %v4258_v9  ;;  %3495 = vmatpush3.bf16.msra.mxu1 %v3835_v18  ;;  %v2589_v0 = vld [vmem:[%s5230_s26] sm:$0x1]  ;;  %v3838_v31 = vld [vmem:[#allocation18 + $0x20] sm:$0xff]   ;;  %v3840_v33 = vld [vmem:[#allocation18 + $0x10] sm:$0xff]  }
 0xbf6   : > { %3496 = vmatprep.subr.bf16.mxu1 %v4258_v9  ;;  %v3839_v32 = vld [vmem:[#allocation18 + $0x18] sm:$0xff]   ;;  %v3841_v34 = vld [vmem:[#allocation18 + $0x8] sm:$0xff]   ;;  %v3842_v35 = vld [vmem:[#allocation18] sm:$0xff]  }
 0xbf7   : > { %3477 = vmatpush3.bf16.msra.mxu0 %v3828_v10  ;;  %v2623_v36 = vld [vmem:[%s5231_s7] sm:$0x1] }
 0xbf8   : > { %3478 = vmatprep.subr.bf16.mxu0 %v4258_v9  ;;  %v2730_v47 = vld [vmem:[%s5232_s21] sm:$0x1] }
 0xbf9   : > { %3497 = vmatpush3.bf16.msra.mxu1 %v3836_v19 }
 0xbfa   : > { %3498 = vmatprep.subr.bf16.mxu1 %v4258_v9 }
 0xbfb   : > { %3479 = vmatpush3.bf16.msra.mxu0 %v3829_v13 }
 0xbfc   : > { %3480 = vmatprep.subr.bf16.mxu0 %v4258_v9 }
 0xbfd   : > { %3499 = vmatpush3.bf16.msra.mxu1 %v3837_v20 }
 0xbfe   : > { %3500 = vmatprep.subr.bf16.mxu1 %v4258_v9 }
 0xbff   : > { %3481 = vmatpush3.bf16.msra.mxu0 %v3830_v14 }
 0xc00   : > { %3482 = vmatprep.subr.bf16.mxu0 %v4258_v9 }
 0xc01   : > { %3501 = vmatpush3.bf16.msra.mxu1 %v3838_v31 }
 0xc02   : > { %3502 = vmatprep.subr.bf16.mxu1 %v4258_v9 }
 0xc03   : > { %3483 = vmatpush3.bf16.msra.mxu0 %v3831_v1 }
 0xc04   : > { %3484 = vmatprep.subr.bf16.mxu0 %v4258_v9 }
 0xc05   : > { %3503 = vmatpush3.bf16.msra.mxu1 %v3839_v32 }
 0xc06   : > { %3504 = vmatprep.subr.bf16.mxu1 %v4258_v9 }
 0xc07   : > { %3485 = vmatpush3.bf16.msra.mxu0 %v3832_v15 }
 0xc08   : > { %3486 = vmatprep.subr.bf16.mxu0 %v4258_v9 }
 0xc09   : > { %3505 = vmatpush3.bf16.msra.mxu1 %v3840_v33 }
 0xc0a   : > { %3506 = vmatprep.subr.bf16.mxu1 %v4258_v9 }
 0xc0b   : > { %3487 = vmatpush3.bf16.msra.mxu0 %v3833_v16 }
 0xc0c   : > { %3488 = vmatprep.subr.bf16.mxu0 %v4258_v9 }
 0xc0d   : > { %3507 = vmatpush3.bf16.msra.mxu1 %v3841_v34 }
 0xc0e   : > { %3508 = vmatprep.subr.bf16.mxu1 %v4258_v9 }
 0xc0f   : > { %3489 = vmatpush3.bf16.msra.mxu0 %v3834_v17 }
 0xc11   : > { %3509 = vmatpush3.bf16.msra.mxu1 %v3842_v35 }
 0xc7c   : > { %v2593_v8 = vpop.xlane.xlu0 %2592 }
 0xc7d   : > { %v2594_v11 = vmul.f32 0.0078125, %v2593_v8 }
 0xc7f   : > { %v2595_v6 = vsub.f32 %v2582_v3, %v2594_v11 }
 0xc81   : > { %v2596_v23 = vmul.f32 %v2595_v6, %v2595_v6 }
 0xc83   : > { %v2597_v12 = vsel %vm2590_vm8, %v2596_v23, 0.0 }
 0xc84   : > { %2598 = vadd.xlane.f32.xlu0 %v2597_v12 }
 0xd0d   : > { %v2599_v21 = vpop.xlane.xlu0 %2598 }
 0xd0e   : > { %v2600_v22 = vmul.f32 0.0078125, %v2599_v21 }
 0xd10   : > { %v2601_v24 = vadd.f32 1e-05, %v2600_v22 }
 0xd12   : > { %3843 = vrsqrt.f32 %v2601_v24 }
 0xd1f   : > { %v3844_v25 = vpop.eup %3843 }
 0xd20   : > { %v2603_v27 = vmul.f32 %v3844_v25, %v2595_v6 }
 0xd22   : > { %v2604_v28 = vmul.f32 %v2603_v27, %v2588_v26 }
 0xd24   : > { %v2605_v29 = vadd.f32 %v2604_v28, %v2589_v0 }
 0xd26   : > { %v2606_v30 = vpack.c.bf16 %v2605_v29, %v2605_v29 }
 0xd28   : > { %3491 = vmatmul.mubr.bf16.vlgmr.msra.gmra.mxu0 %v2606_v30 }
 0xde8   : > { %v2706_v37 = vpop.f32.mrf.mxu0 }
 0xde9   : > { %v2707_v38 = vadd.f32 %v2706_v37, %v2623_v36 }
 0xdea   : > { %v3492_v39 = vpop.f32.mrf.mxu0 }
 0xdeb   : > { %3845 = vtanh.f32 %v2707_v38 }
 0xdec   : > { %v2709_v40 = vpop.f32.mrf.mxu0 }
 0xdee   : > { %v3493_v41 = vpop.f32.mrf.mxu0 }
 0xdf8   : > { %v3846_v42 = vpop.eup %3845 }
 0xdf9   : > { %v2713_v45 = vpack.c.bf16 %v3846_v42, %v3846_v42 }
 0xdfb   : > { %3511 = vmatmul.mubr.bf16.vlgmr.msra.gmra.mxu1 %v2713_v45 }
 0xebb   : > { %v2813_v50 = vpop.f32.mrf.mxu1 }
 0xebc   : > { %v2814_v48 = vadd.f32 %v2813_v50, %v2730_v47 }
 0xebd   : > { %v3512_v49 = vpop.f32.mrf.mxu1 }
 0xebe   : > { %2819 = vst [vmem:[%s986_s24] sm:$0x1] %v2814_v48 }
 0xebf   : > { %v2816_v46 = vpop.f32.mrf.mxu1 }
 0xec1   : > { %v3513_v51 = vpop.f32.mrf.mxu1 }
 0xec2 PF: > { %s5233_s14 = sld [smem:[#allocation32_spill]]  ;;  %s2833_s4 = sshll.u32 %s986_s24, 4  ;;  %s2834_s4 = int_to_ptr.vmem [resolvable:$true] %s2833_s4 }
 0xec3   : > { %s5235_s15 = sld [smem:[#allocation64_spill]]  ;;  %s2821_s16 = scalar_lea.sflag [#allocation6], %s4657_s9 }
 0xec4   : > { %s4095_s6 = scalar_lea.vmem %s2834_s4, 16  ;;  %s4260_s0 = smov [#allocation19]  }
 0xec5   : > { %p4096_p2 = scmp.ne.s32.totalorder %s2834_s4, %s4095_s6  ;;  %s4099_s13 = sshll.u32 %s4260_s0, 4  ;;  %s4100_s13 = int_to_ptr.vmem [resolvable:$false] %s4099_s13 }
 0xec6   : > { %s4101_s25 = scalar_lea.vmem %s4100_s13, 32  ;;  %p4102_p4 = scmp.lt.s32.totalorder %s2834_s4, %s4100_s13 }
 0xec7   : > { %p4097_p7 = pnand %p4096_p2, %p4479_p8  ;;  %p4103_p5 = scmp.lt.s32.totalorder %s4101_s25, %s4095_s6 }
 0xec8   : > { %s3281_s19 = sshll.u32 %s5233_s14, 4 }
 0xec9   : > { %s2831_s8 = scalar_lea.hbm %s5235_s15, %s3281_s19  ;;  %p4098_p10 = pneg %p4097_p7 }
 0xeca   : > { %p4104_p0 = por %p4103_p5, %p4102_p4 }
 0xecc   : > { %p4105_p11 = pnand %p4104_p0, %p4098_p10 }
 0xece   : > { %4108 = shalt.err (!%p4105_p11)
}
 0xecf   : > { %s4109_s29 = scalar_lea.hbm %s2831_s8, 16  ;;  %s4113_s12 = scalar_lea.hbm %s5235_s15, 32 }
 0xed0   : > { %p4110_p3 = scmp.ne.s32.totalorder %s2831_s8, %s4109_s29  ;;  %p4114_p6 = scmp.lt.s32.totalorder %s2831_s8, %s5235_s15 }
 0xed1   : > { %p4115_p13 = scmp.lt.s32.totalorder %s4113_s12, %s4109_s29 }
 0xed2   : > { %p4111_p12 = pnand %p4110_p3, %p4479_p8 }
 0xed3   : > { %p4116_p1 = por %p4115_p13, %p4114_p6 }
 0xed4   : > { %p4112_p9 = pneg %p4111_p12 }
 0xed6   : > { %p4117_p2 = pnand %p4116_p1, %p4112_p9 }
 0xed8   : > { %4120 = shalt.err (!%p4117_p2)
}
 0xed9   : > { %3542 = dma.vmem_to_hbm [thread:$0]  (%p4479_p8), %s2834_s4, 16, %s2831_s8, %s2821_s16  }
 0xeda PF: > { %s5236_s10 = sld [smem:[#allocation35_spill]] }
 0xedb   : > { %s5237_s17 = sld [smem:[#allocation29_spill]] }
 0xedc   : > { %s5238_s18 = sld [smem:[#allocation39_spill]] }
 0xee0   : > { %p3582_p7 = scmp.ge.s32.totalorder %s5236_s10, 2 }
 0xee1   : > { %s2845_s27 = sand.u32 1, %s5237_s17  }
 0xee2   : > { %p5239_p10 = scmp.ne.s32.totalorder %s5238_s18, 0  ;;  %s2846_s26 = scalar_lea.sflag [#allocation6], %s2845_s27 }
 0xee4   : > { %p3574_p4 = pnand %p3582_p7, %p5239_p10 }
 0xee6   : > { %p3575_p5 = pneg %p3574_p4 }
 0xee8   : > { %4190 = dma.done.wait (%p3575_p5), %s2846_s26, 16  }
 0xee9   : > { %4192 = vsyncadd (%p3575_p5), %s2846_s26, 4294967280  ;;  %s46_s4 = sadd.s32 1, %s5236_s10   ;;  %s5240_s1 = sld [smem:[#allocation27_spill]] }
 0xeea   : > { %p43_p0 = scmp.ge.s32.totalorder %s46_s4, 6   ;;  %s5241_s22 = sld [smem:[#allocation28_spill]] }
 0xeeb   : > { %s5242_s23 = sld [smem:[#allocation42_spill]]  ;;  %s5249_s24 = smov %s4211_s2 }
 0xeec   : > { %s5243_s5 = sld [smem:[#allocation30_spill]] }
 0xeed   : > { %s5244_s25 = sld [smem:[#allocation43_spill]] }
 0xeee   : > { %s5245_s3 = sld [smem:[#allocation33_spill]]  ;;  %45 = sbr.rel (!%p43_p0) target bundleno = 38 (0x26), region = 254 }
 0xeef   : > { %s5246_s26 = sld [smem:[#allocation34_spill]] }
 0xef0   : > { %s5247_s27 = sld [smem:[#allocation40_spill]] }
 0xef1   : > { %s5248_s28 = sld [smem:[#allocation41_spill]] }
 0xef2   : > { %s5250_s2 = smov %s5243_s5 }
 0xef3   :  { %2850 = vsyncpa [#allocation5], 1 }
 0xef4   :  { %2852 = vsyncpa [#allocation5 + $0x1], 1 }
 0xef5   :  { %2853 = vsyncpa [#allocation8], 1 }
 0xef6   :  { %2855 = vsyncpa [#allocation8 + $0x1], 1 }
 0xef7   :  { %2856 = vsyncpa [#allocation11], 1 }
 0xef8   :  { %2858 = vsyncpa [#allocation11 + $0x1], 1 }
 0xef9   :  { %2859 = vsyncpa [#allocation14], 1 }
 0xefa   :  { %2861 = vsyncpa [#allocation14 + $0x1], 1 }
 0xefb   :  { %2862 = vsyncpa [#allocation17], 1 }
 0xefc   :  { %2863 = vsyncpa [#allocation6], 1 }
 0xefd   :  { %2865 = vsyncpa [#allocation6 + $0x1], 1 }

</bundles_post_ra>
